<compile_context>
chip_gen: v7x
topology: tpu7x:2x2x1
jax: 0.10.0
libtpu: 0.0.40
codegen_flags: <defaults>
</compile_context>

<pallas_src>
import functools

import jax
import jax.numpy as jnp
from jax.experimental import pallas as pl
from jax.experimental.pallas import tpu as pltpu


# Tile targets: tm<=512, tk=512, tn=256 keeps double-buffered tiles a few MiB,
# comfortably inside every generation's scoped-VMEM budget (v5e 16 MiB default,
# v6e/v7x 32 MiB default, v7x 64 MiB physical).
_TM, _TK, _TN = 512, 512, 256
_VMEM_LIMIT = 48 * 1024 * 1024  # above v5e/v6e defaults, below v7x physical.


def _round_up(x, m):
    return (x + m - 1) // m * m


# ----------------- Pallas kernel: tiled matmul + bias (+LeakyReLU) ----------

def _matmul_bias_act_kernel(a_ref, b_ref, bias_ref, o_ref, acc_ref, *, leaky):
    # a: (tm, tk) bf16, b: (tk, tn) bf16, bias: (1, tn) f32, acc: (tm, tn) f32.
    k = pl.program_id(2)

    @pl.when(k == 0)
    def _():
        acc_ref[...] = jnp.zeros_like(acc_ref)

    acc_ref[...] += jnp.dot(a_ref[...], b_ref[...],
                            preferred_element_type=jnp.float32)

    @pl.when(k == pl.num_programs(2) - 1)
    def _():
        acc = acc_ref[...] + bias_ref[...]          # epilogue stays in f32
        if leaky:                                   # fused LeakyReLU(0.2)
            acc = jnp.where(acc >= 0, acc, 0.2 * acc)
        o_ref[...] = acc.astype(o_ref.dtype)


def _matmul_bias_act(a, b, bias, *, leaky):
    """(M,K) @ (K,N) + bias(1,N) [+ LeakyReLU]. bf16 MXU inputs, f32 accumulate."""
    M, K = a.shape
    _, N = b.shape

    tm = min(_TM, _round_up(M, 8))
    tk = min(_TK, _round_up(K, 128))
    tn = min(_TN, _round_up(N, 128))
    Mp, Kp, Np = _round_up(M, tm), _round_up(K, tk), _round_up(N, tn)

    # Zero-pad to tile multiples (padded K rows / N cols contribute nothing and
    # are sliced off below); cast MXU operands to bf16, keep bias in f32.
    a = jnp.pad(a, ((0, Mp - M), (0, Kp - K))).astype(jnp.bfloat16)
    b = jnp.pad(b, ((0, Kp - K), (0, Np - N))).astype(jnp.bfloat16)
    bias = jnp.pad(bias.astype(jnp.float32), ((0, 0), (0, Np - N)))

    grid = (Mp // tm, Np // tn, Kp // tk)
    kern = functools.partial(_matmul_bias_act_kernel, leaky=leaky)
    out = pl.pallas_call(
        kern,
        out_shape=jax.ShapeDtypeStruct((Mp, Np), jnp.float32),
        grid_spec=pltpu.PrefetchScalarGridSpec(
            num_scalar_prefetch=0,
            grid=grid,
            in_specs=[
                pl.BlockSpec((tm, tk), lambda i, j, k: (i, k)),
                pl.BlockSpec((tk, tn), lambda i, j, k: (k, j)),
                pl.BlockSpec((1, tn), lambda i, j, k: (0, j)),
            ],
            out_specs=pl.BlockSpec((tm, tn), lambda i, j, k: (i, j)),
            scratch_shapes=[pltpu.VMEM((tm, tn), jnp.float32)],
        ),
        compiler_params=pltpu.CompilerParams(
            dimension_semantics=("parallel", "parallel", "arbitrary"),
            vmem_limit_bytes=_VMEM_LIMIT,
        ),
        cost_estimate=pl.CostEstimate(
            flops=2 * Mp * Kp * Np,
            transcendentals=0,
            bytes_accessed=2 * Mp * Kp + 2 * Kp * Np + 4 * Mp * Np + 4 * Np,
        ),
    )(a, b, bias)
    return out[:M, :N]


# ------- Pallas kernel: tiled matmul + bias + InstanceNorm + LeakyReLU -------

def _matmul_bias_inorm_lrelu_kernel(a_ref, b_ref, bias_ref, o_ref, acc_ref,
                                    *, valid_rows):
    # Grid axis 0 indexes one image; the (tm, tn) accumulator therefore holds
    # the full spatial extent (Ho*Wo rows, padded to tm) for tn channels, so
    # per-channel InstanceNorm stats can be computed right in the epilogue.
    k = pl.program_id(2)

    @pl.when(k == 0)
    def _():
        acc_ref[...] = jnp.zeros_like(acc_ref)

    acc_ref[...] += jnp.dot(a_ref[...], b_ref[...],
                            preferred_element_type=jnp.float32)

    @pl.when(k == pl.num_programs(2) - 1)
    def _():
        y = acc_ref[...] + bias_ref[...]            # (tm, tn) f32
        tm = y.shape[0]
        if valid_rows == tm:
            mean = jnp.mean(y, axis=0, keepdims=True)
            yc = y - mean
            var = jnp.mean(yc * yc, axis=0, keepdims=True)
        else:
            # Mask off padded rows (they only hold bias) from the statistics.
            row = jax.lax.broadcasted_iota(jnp.int32, (tm, 1), 0)
            mask = (row < valid_rows).astype(jnp.float32)
            inv_n = 1.0 / float(valid_rows)
            mean = jnp.sum(y * mask, axis=0, keepdims=True) * inv_n
            yc = y - mean
            var = jnp.sum(yc * yc * mask, axis=0, keepdims=True) * inv_n
        yn = yc * jax.lax.rsqrt(var + 1e-5)
        o_ref[...] = jnp.where(yn >= 0, yn, 0.2 * yn).astype(o_ref.dtype)


def _matmul_bias_inorm_lrelu(a, b, bias, *, n_img, rows):
    """Per-image (rows,K)@(K,N)+bias -> InstanceNorm -> LeakyReLU, fused."""
    M, K = a.shape
    _, N = b.shape
    assert M == n_img * rows

    tm = _round_up(rows, 8)                  # full per-image spatial extent
    tk = min(_TK, _round_up(K, 128))
    tn = min(_TN, _round_up(N, 128))
    Kp, Np = _round_up(K, tk), _round_up(N, tn)

    # Pad per-image rows to tm so grid axis 0 addresses exactly one image.
    a = a.reshape(n_img, rows, K)
    a = jnp.pad(a, ((0, 0), (0, tm - rows), (0, Kp - K))).astype(jnp.bfloat16)
    a = a.reshape(n_img * tm, Kp)
    b = jnp.pad(b, ((0, Kp - K), (0, Np - N))).astype(jnp.bfloat16)
    bias = jnp.pad(bias.astype(jnp.float32), ((0, 0), (0, Np - N)))

    grid = (n_img, Np // tn, Kp // tk)
    kern = functools.partial(_matmul_bias_inorm_lrelu_kernel, valid_rows=rows)
    out = pl.pallas_call(
        kern,
        out_shape=jax.ShapeDtypeStruct((n_img * tm, Np), jnp.float32),
        grid_spec=pltpu.PrefetchScalarGridSpec(
            num_scalar_prefetch=0,
            grid=grid,
            in_specs=[
                pl.BlockSpec((tm, tk), lambda i, j, k: (i, k)),
                pl.BlockSpec((tk, tn), lambda i, j, k: (k, j)),
                pl.BlockSpec((1, tn), lambda i, j, k: (0, j)),
            ],
            out_specs=pl.BlockSpec((tm, tn), lambda i, j, k: (i, j)),
            scratch_shapes=[pltpu.VMEM((tm, tn), jnp.float32)],
        ),
        compiler_params=pltpu.CompilerParams(
            dimension_semantics=("parallel", "parallel", "arbitrary"),
            vmem_limit_bytes=_VMEM_LIMIT,
        ),
        cost_estimate=pl.CostEstimate(
            flops=2 * n_img * tm * Kp * Np,
            transcendentals=0,
            bytes_accessed=(2 * n_img * tm * Kp + 2 * Kp * Np
                            + 4 * n_img * tm * Np + 4 * Np),
        ),
    )(a, b, bias)
    out = out.reshape(n_img, tm, Np)[:, :rows, :N]
    return out.reshape(n_img * rows, N)


def _fused_inorm_fits(rows, K, Cout):
    # Conservative VMEM estimate for the fused tile set (double-buffered A/B
    # and output, plus the f32 accumulator). Leave headroom under the limit.
    tm = _round_up(rows, 8)
    tk = min(_TK, _round_up(K, 128))
    tn = min(_TN, _round_up(Cout, 128))
    used = (2 * tm * tk * 2      # A, bf16, double buffered
            + 2 * tk * tn * 2    # B, bf16, double buffered
            + tm * tn * 4        # f32 accumulator scratch
            + 2 * tm * tn * 4)   # output, f32, double buffered
    return used <= _VMEM_LIMIT - (8 << 20)


# ---- Pallas kernel: standalone InstanceNorm2d + LeakyReLU (NHWC fallback) ---

def _inorm_lrelu_kernel(x_ref, o_ref):
    # x: (1, H, W, tc). Per-channel stats over the spatial axes, f32 math.
    x = x_ref[...].astype(jnp.float32)
    mean = jnp.mean(x, axis=(1, 2), keepdims=True)
    xc = x - mean
    var = jnp.mean(xc * xc, axis=(1, 2), keepdims=True)
    y = xc * jax.lax.rsqrt(var + 1e-5)
    o_ref[...] = jnp.where(y >= 0, y, 0.2 * y).astype(o_ref.dtype)


def instancenorm_lrelu_nhwc(x):
    N, H, W, C = x.shape
    tc = 128 if C % 128 == 0 else C      # lane-dense channel blocks when possible
    grid = (N, C // tc)
    return pl.pallas_call(
        _inorm_lrelu_kernel,
        out_shape=jax.ShapeDtypeStruct((N, H, W, C), x.dtype),
        grid=grid,
        in_specs=[pl.BlockSpec((1, H, W, tc), lambda n, c: (n, 0, 0, c))],
        out_specs=pl.BlockSpec((1, H, W, tc), lambda n, c: (n, 0, 0, c)),
        compiler_params=pltpu.CompilerParams(
            dimension_semantics=("parallel", "parallel"),
            vmem_limit_bytes=_VMEM_LIMIT,
        ),
    )(x)


# ------------------------------ JAX glue (NHWC) ------------------------------

def _reflect_pad_nhwc(x, pad):
    if pad == 0:
        return x
    return jnp.pad(x, ((0, 0), (pad, pad), (pad, pad), (0, 0)), mode="reflect")


def _im2col_nhwc(xp, k, stride):
    # xp: padded NHWC. Returns (N*Ho*Wo, k*k*Cin) with (kh, kw, Cin) ordering.
    N, Hp, Wp, C = xp.shape
    Ho = (Hp - k) // stride + 1
    Wo = (Wp - k) // stride + 1
    cols = []
    for di in range(k):
        for dj in range(k):
            cols.append(
                xp[:, di:di + stride * (Ho - 1) + 1:stride,
                      dj:dj + stride * (Wo - 1) + 1:stride, :])
    patches = jnp.stack(cols, axis=3)                 # (N, Ho, Wo, k*k, C)
    patches = patches.reshape(N * Ho * Wo, k * k * C)
    return patches, Ho, Wo


def conv2d_nhwc(x, w, b, *, stride, pad, leaky=False, inorm=False):
    # x: NHWC, w: (Cout, Cin, k, k) PyTorch OIHW layout, reflect padding.
    N = x.shape[0]
    Cout, Cin, k, _ = w.shape
    xp = _reflect_pad_nhwc(x, pad)
    patches, Ho, Wo = _im2col_nhwc(xp, k, stride)
    w2 = jnp.transpose(w, (2, 3, 1, 0)).reshape(k * k * Cin, Cout)  # (kh,kw,Cin) rows
    bias = b.reshape(1, Cout)

    if inorm and _fused_inorm_fits(Ho * Wo, k * k * Cin, Cout):
        out = _matmul_bias_inorm_lrelu(patches, w2, bias, n_img=N, rows=Ho * Wo)
        return out.reshape(N, Ho, Wo, Cout)

    out = _matmul_bias_act(patches, w2, bias, leaky=leaky)
    out = out.reshape(N, Ho, Wo, Cout)
    if inorm:
        out = instancenorm_lrelu_nhwc(out)
    return out


# ------------------------------- Discriminator -------------------------------

def init_discriminator_params(key, input_channels, hidden_channels):
    hc = hidden_channels
    shapes = {
        "up":  (hc,      input_channels, 7, 7),
        "c1":  (hc * 2,  hc,             4, 4),
        "c2":  (hc * 4,  hc * 2,         4, 4),
        "c3":  (hc * 8,  hc * 4,         4, 4),
        "fin": (1,       hc * 8,         1, 1),
    }
    params = {}
    for name, shp in shapes.items():
        key, kw, kb = jax.random.split(key, 3)
        params[name + "_w"] = 0.05 * jax.random.normal(kw, shp, jnp.float32)
        params[name + "_b"] = 0.05 * jax.random.normal(kb, (shp[0],), jnp.float32)
    return params


def discriminator_forward(x_nchw, params):
    # Layout conversion only at ingress/egress; network is channels-last inside.
    x = jnp.transpose(x_nchw, (0, 2, 3, 1))
    # upfeature: 7x7 reflect conv, stride 1, no norm, no activation.
    x0 = conv2d_nhwc(x, params["up_w"], params["up_b"], stride=1, pad=3)
    # contract1: 4x4 stride-2 reflect conv, no norm, LeakyReLU(0.2) fused.
    x1 = conv2d_nhwc(x0, params["c1_w"], params["c1_b"], stride=2, pad=1, leaky=True)
    # TODO(synk): the original forward calls self.contract1(x1) a second time,
    # which is a 64->128 conv applied to a 128-channel tensor and raises in
    # PyTorch; implemented with the intended contract2 block instead.
    # contract2 / contract3: conv -> InstanceNorm -> LeakyReLU, fully fused.
    x2 = conv2d_nhwc(x1, params["c2_w"], params["c2_b"], stride=2, pad=1, inorm=True)
    x3 = conv2d_nhwc(x2, params["c3_w"], params["c3_b"], stride=2, pad=1, inorm=True)
    # final 1x1 conv
    xn = conv2d_nhwc(x3, params["fin_w"], params["fin_b"], stride=1, pad=0)
    return jnp.transpose(xn, (0, 3, 1, 2))


# ------------------------- pure-JAX reference check --------------------------

def _ref_conv(x, w, b, stride, pad):
    if pad:
        x = jnp.pad(x, ((0, 0), (0, 0), (pad, pad), (pad, pad)), mode="reflect")
    # Same bf16-in / f32-accumulate precision as the Pallas MXU path.
    out = jax.lax.conv_general_dilated(
        x.astype(jnp.bfloat16), w.astype(jnp.bfloat16), (stride, stride), "VALID",
        dimension_numbers=("NCHW", "OIHW", "NCHW"),
        preferred_element_type=jnp.float32)
    return out + b.reshape(1, -1, 1, 1)


def _ref_inorm_lrelu(x):
    mean = jnp.mean(x, axis=(2, 3), keepdims=True)
    var = jnp.mean((x - mean) ** 2, axis=(2, 3), keepdims=True)
    y = (x - mean) * jax.lax.rsqrt(var + 1e-5)
    return jnp.where(y >= 0, y, 0.2 * y)


def _ref_forward(x, p):
    x0 = _ref_conv(x, p["up_w"], p["up_b"], 1, 3)
    x1 = _ref_conv(x0, p["c1_w"], p["c1_b"], 2, 1)
    x1 = jnp.where(x1 >= 0, x1, 0.2 * x1)
    x2 = _ref_inorm_lrelu(_ref_conv(x1, p["c2_w"], p["c2_b"], 2, 1))
    x3 = _ref_inorm_lrelu(_ref_conv(x2, p["c3_w"], p["c3_b"], 2, 1))
    return _ref_conv(x3, p["fin_w"], p["fin_b"], 1, 0)


# ----------------------------------- main ------------------------------------

if __name__ == "__main__":
    key = jax.random.PRNGKey(0)
    k_x, k_p = jax.random.split(key)

    # Small shapes: batch=2, input_channels=4, hidden_channels=8, spatial=16.
    x = jax.random.normal(k_x, (2, 4, 16, 16), jnp.float32)
    params = init_discriminator_params(k_p, input_channels=4, hidden_channels=8)

    out = jax.block_until_ready(jax.jit(discriminator_forward)(x, params))
    assert out.shape == (2, 1, 2, 2), out.shape

    ref = jax.block_until_ready(_ref_forward(x, params))
    max_err = float(jnp.max(jnp.abs(out - ref)))
    assert jnp.allclose(out, ref, atol=2e-2, rtol=2e-2), max_err

    print("KERNEL_OK")
</pallas_src>

<mosaic_0001>
module attributes {stable_mosaic.version = 11 : i64} {
  func.func @_matmul_bias_act_kernel(%arg0: i32, %arg1: i32, %arg2: i32, %arg3: memref<512x256xbf16, #tpu.memory_space<vmem>>, %arg4: memref<256x128xbf16, #tpu.memory_space<vmem>>, %arg5: memref<1x128xf32, #tpu.memory_space<vmem>>, %arg6: memref<512x128xf32, #tpu.memory_space<vmem>>, %arg7: memref<512x128xf32, #tpu.memory_space<vmem>>) attributes {dimension_semantics = [#tpu.dimension_semantics<parallel>, #tpu.dimension_semantics<parallel>, #tpu.dimension_semantics<arbitrary>], iteration_bounds = array<i64: 1, 1, 1>, scalar_prefetch = 0 : i64, scratch_operands = 1 : i64, tpu.core_type = #tpu.core_type<tc>, window_params = [{transform_indices = @transform_0, window_bounds = array<i64: 512, 256>}, {transform_indices = @transform_1, window_bounds = array<i64: 256, 128>}, {transform_indices = @transform_2, window_bounds = array<i64: 1, 128>}, {transform_indices = @transform_3, window_bounds = array<i64: 512, 128>}]} {
    %c0_i32 = arith.constant 0 : i32
    %0 = arith.cmpi eq, %arg2, %c0_i32 : i32
    %1 = arith.extui %0 : i1 to i32
    %c0_i32_0 = arith.constant 0 : i32
    %2 = arith.cmpi ne, %1, %c0_i32_0 : i32
    scf.if %2 {
      %cst_10 = arith.constant 0.000000e+00 : f32
      %12 = vector.broadcast %cst_10 : f32 to vector<512x128xf32>
      %c0_11 = arith.constant 0 : index
      %c0_12 = arith.constant 0 : index
      %13 = vector.load %arg7[%c0_11, %c0_12] : memref<512x128xf32, #tpu.memory_space<vmem>>, vector<512x128xf32>
      tpu.vector_store %arg7[%c0_11, %c0_12], %12 {strides = array<i32>} : memref<512x128xf32, #tpu.memory_space<vmem>>, vector<512x128xf32>,
    } else {
    }
    %c0 = arith.constant 0 : index
    %c0_1 = arith.constant 0 : index
    %3 = vector.load %arg7[%c0, %c0_1] : memref<512x128xf32, #tpu.memory_space<vmem>>, vector<512x128xf32>
    %c0_2 = arith.constant 0 : index
    %c0_3 = arith.constant 0 : index
    %4 = vector.load %arg3[%c0_2, %c0_3] : memref<512x256xbf16, #tpu.memory_space<vmem>>, vector<512x256xbf16>
    %c0_4 = arith.constant 0 : index
    %c0_5 = arith.constant 0 : index
    %5 = vector.load %arg4[%c0_4, %c0_5] : memref<256x128xbf16, #tpu.memory_space<vmem>>, vector<256x128xbf16>
    %cst = arith.constant dense<0.000000e+00> : vector<512x128xf32>
    %6 = tpu.matmul %4, %5, %cst {dimension_numbers = #tpu.dot_dimension_numbers<[1], [0], [0], [1], [0, 0, 1, 1], [], []>} : vector<512x256xbf16>, vector<256x128xbf16>, vector<512x128xf32> -> vector<512x128xf32>
    %7 = arith.addf %3, %6 : vector<512x128xf32>
    %c0_6 = arith.constant 0 : index
    %c0_7 = arith.constant 0 : index
    %8 = vector.load %arg7[%c0_6, %c0_7] : memref<512x128xf32, #tpu.memory_space<vmem>>, vector<512x128xf32>
    tpu.vector_store %arg7[%c0_6, %c0_7], %7 {strides = array<i32>} : memref<512x128xf32, #tpu.memory_space<vmem>>, vector<512x128xf32>,
    %c0_i32_8 = arith.constant 0 : i32
    %9 = arith.cmpi eq, %arg2, %c0_i32_8 : i32
    %10 = arith.extui %9 : i1 to i32
    %c0_i32_9 = arith.constant 0 : i32
    %11 = arith.cmpi ne, %10, %c0_i32_9 : i32
    scf.if %11 {
      %c0_10 = arith.constant 0 : index
      %c0_11 = arith.constant 0 : index
      %12 = vector.load %arg7[%c0_10, %c0_11] : memref<512x128xf32, #tpu.memory_space<vmem>>, vector<512x128xf32>
      %c0_12 = arith.constant 0 : index
      %c0_13 = arith.constant 0 : index
      %13 = vector.load %arg5[%c0_12, %c0_13] : memref<1x128xf32, #tpu.memory_space<vmem>>, vector<1x128xf32>
      %14 = vector.broadcast %13 : vector<1x128xf32> to vector<512x128xf32>
      %15 = arith.addf %12, %14 : vector<512x128xf32>
      %c0_14 = arith.constant 0 : index
      %c0_15 = arith.constant 0 : index
      %16 = vector.load %arg6[%c0_14, %c0_15] : memref<512x128xf32, #tpu.memory_space<vmem>>, vector<512x128xf32>
      tpu.vector_store %arg6[%c0_14, %c0_15], %15 {strides = array<i32>} : memref<512x128xf32, #tpu.memory_space<vmem>>, vector<512x128xf32>,
    } else {
    }
    return
  }
  func.func @transform_0(%arg0: i32, %arg1: i32, %arg2: i32) -> (i32, i32) {
    %c0_i32 = arith.constant 0 : i32
    return %arg0, %arg2 : i32, i32
  }
  func.func @transform_1(%arg0: i32, %arg1: i32, %arg2: i32) -> (i32, i32) {
    %c0_i32 = arith.constant 0 : i32
    return %arg2, %arg1 : i32, i32
  }
  func.func @transform_2(%arg0: i32, %arg1: i32, %arg2: i32) -> (i32, i32) {
    %c0_i32 = arith.constant 0 : i32
    %c0_i32_0 = arith.constant 0 : i32
    return %c0_i32, %arg1 : i32, i32
  }
  func.func @transform_3(%arg0: i32, %arg1: i32, %arg2: i32) -> (i32, i32) {
    %c0_i32 = arith.constant 0 : i32
    return %arg0, %arg1 : i32, i32
  }
}

module attributes {stable_mosaic.version = 11 : i64} {
  func.func @_matmul_bias_act_kernel(%arg0: i32, %arg1: i32, %arg2: i32, %arg3: memref<128x128xbf16, #tpu.memory_space<vmem>>, %arg4: memref<128x128xbf16, #tpu.memory_space<vmem>>, %arg5: memref<1x128xf32, #tpu.memory_space<vmem>>, %arg6: memref<128x128xf32, #tpu.memory_space<vmem>>, %arg7: memref<128x128xf32, #tpu.memory_space<vmem>>) attributes {dimension_semantics = [#tpu.dimension_semantics<parallel>, #tpu.dimension_semantics<parallel>, #tpu.dimension_semantics<arbitrary>], iteration_bounds = array<i64: 1, 1, 1>, scalar_prefetch = 0 : i64, scratch_operands = 1 : i64, tpu.core_type = #tpu.core_type<tc>, window_params = [{transform_indices = @transform_0, window_bounds = array<i64: 128, 128>}, {transform_indices = @transform_1, window_bounds = array<i64: 128, 128>}, {transform_indices = @transform_2, window_bounds = array<i64: 1, 128>}, {transform_indices = @transform_3, window_bounds = array<i64: 128, 128>}]} {
    %c0_i32 = arith.constant 0 : i32
    %0 = arith.cmpi eq, %arg2, %c0_i32 : i32
    %1 = arith.extui %0 : i1 to i32
    %c0_i32_0 = arith.constant 0 : i32
    %2 = arith.cmpi ne, %1, %c0_i32_0 : i32
    scf.if %2 {
      %cst_10 = arith.constant 0.000000e+00 : f32
      %12 = vector.broadcast %cst_10 : f32 to vector<128x128xf32>
      %c0_11 = arith.constant 0 : index
      %c0_12 = arith.constant 0 : index
      %13 = vector.load %arg7[%c0_11, %c0_12] : memref<128x128xf32, #tpu.memory_space<vmem>>, vector<128x128xf32>
      tpu.vector_store %arg7[%c0_11, %c0_12], %12 {strides = array<i32>} : memref<128x128xf32, #tpu.memory_space<vmem>>, vector<128x128xf32>,
    } else {
    }
    %c0 = arith.constant 0 : index
    %c0_1 = arith.constant 0 : index
    %3 = vector.load %arg7[%c0, %c0_1] : memref<128x128xf32, #tpu.memory_space<vmem>>, vector<128x128xf32>
    %c0_2 = arith.constant 0 : index
    %c0_3 = arith.constant 0 : index
    %4 = vector.load %arg3[%c0_2, %c0_3] : memref<128x128xbf16, #tpu.memory_space<vmem>>, vector<128x128xbf16>
    %c0_4 = arith.constant 0 : index
    %c0_5 = arith.constant 0 : index
    %5 = vector.load %arg4[%c0_4, %c0_5] : memref<128x128xbf16, #tpu.memory_space<vmem>>, vector<128x128xbf16>
    %cst = arith.constant dense<0.000000e+00> : vector<128x128xf32>
    %6 = tpu.matmul %4, %5, %cst {dimension_numbers = #tpu.dot_dimension_numbers<[1], [0], [0], [1], [0, 0, 1, 1], [], []>} : vector<128x128xbf16>, vector<128x128xbf16>, vector<128x128xf32> -> vector<128x128xf32>
    %7 = arith.addf %3, %6 : vector<128x128xf32>
    %c0_6 = arith.constant 0 : index
    %c0_7 = arith.constant 0 : index
    %8 = vector.load %arg7[%c0_6, %c0_7] : memref<128x128xf32, #tpu.memory_space<vmem>>, vector<128x128xf32>
    tpu.vector_store %arg7[%c0_6, %c0_7], %7 {strides = array<i32>} : memref<128x128xf32, #tpu.memory_space<vmem>>, vector<128x128xf32>,
    %c0_i32_8 = arith.constant 0 : i32
    %9 = arith.cmpi eq, %arg2, %c0_i32_8 : i32
    %10 = arith.extui %9 : i1 to i32
    %c0_i32_9 = arith.constant 0 : i32
    %11 = arith.cmpi ne, %10, %c0_i32_9 : i32
    scf.if %11 {
      %c0_10 = arith.constant 0 : index
      %c0_11 = arith.constant 0 : index
      %12 = vector.load %arg7[%c0_10, %c0_11] : memref<128x128xf32, #tpu.memory_space<vmem>>, vector<128x128xf32>
      %c0_12 = arith.constant 0 : index
      %c0_13 = arith.constant 0 : index
      %13 = vector.load %arg5[%c0_12, %c0_13] : memref<1x128xf32, #tpu.memory_space<vmem>>, vector<1x128xf32>
      %14 = vector.broadcast %13 : vector<1x128xf32> to vector<128x128xf32>
      %15 = arith.addf %12, %14 : vector<128x128xf32>
      %cst_14 = arith.constant 0.000000e+00 : f32
      %16 = vector.broadcast %cst_14 : f32 to vector<128x128xf32>
      %17 = arith.cmpf oge, %15, %16 : vector<128x128xf32>
      %cst_15 = arith.constant 2.000000e-01 : f32
      %18 = vector.broadcast %cst_15 : f32 to vector<128x128xf32>
      %19 = arith.mulf %18, %15 : vector<128x128xf32>
      %20 = arith.select %17, %15, %19 : vector<128x128xi1>, vector<128x128xf32>
      %c0_16 = arith.constant 0 : index
      %c0_17 = arith.constant 0 : index
      %21 = vector.load %arg6[%c0_16, %c0_17] : memref<128x128xf32, #tpu.memory_space<vmem>>, vector<128x128xf32>
      tpu.vector_store %arg6[%c0_16, %c0_17], %20 {strides = array<i32>} : memref<128x128xf32, #tpu.memory_space<vmem>>, vector<128x128xf32>,
    } else {
    }
    return
  }
  func.func @transform_0(%arg0: i32, %arg1: i32, %arg2: i32) -> (i32, i32) {
    %c0_i32 = arith.constant 0 : i32
    return %arg0, %arg2 : i32, i32
  }
  func.func @transform_1(%arg0: i32, %arg1: i32, %arg2: i32) -> (i32, i32) {
    %c0_i32 = arith.constant 0 : i32
    return %arg2, %arg1 : i32, i32
  }
  func.func @transform_2(%arg0: i32, %arg1: i32, %arg2: i32) -> (i32, i32) {
    %c0_i32 = arith.constant 0 : i32
    %c0_i32_0 = arith.constant 0 : i32
    return %c0_i32, %arg1 : i32, i32
  }
  func.func @transform_3(%arg0: i32, %arg1: i32, %arg2: i32) -> (i32, i32) {
    %c0_i32 = arith.constant 0 : i32
    return %arg0, %arg1 : i32, i32
  }
}

module attributes {stable_mosaic.version = 11 : i64} {
  func.func @_matmul_bias_inorm_lrelu_kernel(%arg0: i32, %arg1: i32, %arg2: i32, %arg3: memref<16x256xbf16, #tpu.memory_space<vmem>>, %arg4: memref<256x128xbf16, #tpu.memory_space<vmem>>, %arg5: memref<1x128xf32, #tpu.memory_space<vmem>>, %arg6: memref<16x128xf32, #tpu.memory_space<vmem>>, %arg7: memref<16x128xf32, #tpu.memory_space<vmem>>) attributes {dimension_semantics = [#tpu.dimension_semantics<parallel>, #tpu.dimension_semantics<parallel>, #tpu.dimension_semantics<arbitrary>], iteration_bounds = array<i64: 2, 1, 1>, scalar_prefetch = 0 : i64, scratch_operands = 1 : i64, tpu.core_type = #tpu.core_type<tc>, window_params = [{transform_indices = @transform_0, window_bounds = array<i64: 16, 256>}, {transform_indices = @transform_1, window_bounds = array<i64: 256, 128>}, {transform_indices = @transform_2, window_bounds = array<i64: 1, 128>}, {transform_indices = @transform_3, window_bounds = array<i64: 16, 128>}]} {
    %c0_i32 = arith.constant 0 : i32
    %0 = arith.cmpi eq, %arg2, %c0_i32 : i32
    %1 = arith.extui %0 : i1 to i32
    %c0_i32_0 = arith.constant 0 : i32
    %2 = arith.cmpi ne, %1, %c0_i32_0 : i32
    scf.if %2 {
      %cst_10 = arith.constant 0.000000e+00 : f32
      %12 = vector.broadcast %cst_10 : f32 to vector<16x128xf32>
      %c0_11 = arith.constant 0 : index
      %c0_12 = arith.constant 0 : index
      %13 = vector.load %arg7[%c0_11, %c0_12] : memref<16x128xf32, #tpu.memory_space<vmem>>, vector<16x128xf32>
      tpu.vector_store %arg7[%c0_11, %c0_12], %12 {strides = array<i32>} : memref<16x128xf32, #tpu.memory_space<vmem>>, vector<16x128xf32>,
    } else {
    }
    %c0 = arith.constant 0 : index
    %c0_1 = arith.constant 0 : index
    %3 = vector.load %arg7[%c0, %c0_1] : memref<16x128xf32, #tpu.memory_space<vmem>>, vector<16x128xf32>
    %c0_2 = arith.constant 0 : index
    %c0_3 = arith.constant 0 : index
    %4 = vector.load %arg3[%c0_2, %c0_3] : memref<16x256xbf16, #tpu.memory_space<vmem>>, vector<16x256xbf16>
    %c0_4 = arith.constant 0 : index
    %c0_5 = arith.constant 0 : index
    %5 = vector.load %arg4[%c0_4, %c0_5] : memref<256x128xbf16, #tpu.memory_space<vmem>>, vector<256x128xbf16>
    %cst = arith.constant dense<0.000000e+00> : vector<16x128xf32>
    %6 = tpu.matmul %4, %5, %cst {dimension_numbers = #tpu.dot_dimension_numbers<[1], [0], [0], [1], [0, 0, 1, 1], [], []>} : vector<16x256xbf16>, vector<256x128xbf16>, vector<16x128xf32> -> vector<16x128xf32>
    %7 = arith.addf %3, %6 : vector<16x128xf32>
    %c0_6 = arith.constant 0 : index
    %c0_7 = arith.constant 0 : index
    %8 = vector.load %arg7[%c0_6, %c0_7] : memref<16x128xf32, #tpu.memory_space<vmem>>, vector<16x128xf32>
    tpu.vector_store %arg7[%c0_6, %c0_7], %7 {strides = array<i32>} : memref<16x128xf32, #tpu.memory_space<vmem>>, vector<16x128xf32>,
    %c0_i32_8 = arith.constant 0 : i32
    %9 = arith.cmpi eq, %arg2, %c0_i32_8 : i32
    %10 = arith.extui %9 : i1 to i32
    %c0_i32_9 = arith.constant 0 : i32
    %11 = arith.cmpi ne, %10, %c0_i32_9 : i32
    scf.if %11 {
      %c0_10 = arith.constant 0 : index
      %c0_11 = arith.constant 0 : index
      %12 = vector.load %arg7[%c0_10, %c0_11] : memref<16x128xf32, #tpu.memory_space<vmem>>, vector<16x128xf32>
      %c0_12 = arith.constant 0 : index
      %c0_13 = arith.constant 0 : index
      %13 = vector.load %arg5[%c0_12, %c0_13] : memref<1x128xf32, #tpu.memory_space<vmem>>, vector<1x128xf32>
      %14 = vector.broadcast %13 : vector<1x128xf32> to vector<16x128xf32>
      %15 = arith.addf %12, %14 : vector<16x128xf32>
      %cst_14 = arith.constant dense<0.000000e+00> : vector<128xf32>
      %16 = vector.multi_reduction <add>, %15, %cst_14 [0] : vector<16x128xf32> to vector<128xf32>
      %17 = vector.shape_cast %16 : vector<128xf32> to vector<1x128xf32>
      %cst_15 = arith.constant 1.600000e+01 : f32
      %18 = vector.broadcast %cst_15 : f32 to vector<1x128xf32>
      %19 = arith.divf %17, %18 : vector<1x128xf32>
      %20 = vector.broadcast %19 : vector<1x128xf32> to vector<16x128xf32>
      %21 = arith.subf %15, %20 : vector<16x128xf32>
      %22 = arith.mulf %21, %21 : vector<16x128xf32>
      %cst_16 = arith.constant dense<0.000000e+00> : vector<128xf32>
      %23 = vector.multi_reduction <add>, %22, %cst_16 [0] : vector<16x128xf32> to vector<128xf32>
      %24 = vector.shape_cast %23 : vector<128xf32> to vector<1x128xf32>
      %cst_17 = arith.constant 1.600000e+01 : f32
      %25 = vector.broadcast %cst_17 : f32 to vector<1x128xf32>
      %26 = arith.divf %24, %25 : vector<1x128xf32>
      %cst_18 = arith.constant 9.99999974E-6 : f32
      %27 = vector.broadcast %cst_18 : f32 to vector<1x128xf32>
      %28 = arith.addf %26, %27 : vector<1x128xf32>
      %29 = math.rsqrt %28 : vector<1x128xf32>
      %30 = vector.broadcast %29 : vector<1x128xf32> to vector<16x128xf32>
      %31 = arith.mulf %21, %30 : vector<16x128xf32>
      %cst_19 = arith.constant 0.000000e+00 : f32
      %32 = vector.broadcast %cst_19 : f32 to vector<16x128xf32>
      %33 = arith.cmpf oge, %31, %32 : vector<16x128xf32>
      %cst_20 = arith.constant 2.000000e-01 : f32
      %34 = vector.broadcast %cst_20 : f32 to vector<16x128xf32>
      %35 = arith.mulf %34, %31 : vector<16x128xf32>
      %36 = arith.select %33, %31, %35 : vector<16x128xi1>, vector<16x128xf32>
      %c0_21 = arith.constant 0 : index
      %c0_22 = arith.constant 0 : index
      %37 = vector.load %arg6[%c0_21, %c0_22] : memref<16x128xf32, #tpu.memory_space<vmem>>, vector<16x128xf32>
      tpu.vector_store %arg6[%c0_21, %c0_22], %36 {strides = array<i32>} : memref<16x128xf32, #tpu.memory_space<vmem>>, vector<16x128xf32>,
    } else {
    }
    return
  }
  func.func @transform_0(%arg0: i32, %arg1: i32, %arg2: i32) -> (i32, i32) {
    %c0_i32 = arith.constant 0 : i32
    return %arg0, %arg2 : i32, i32
  }
  func.func @transform_1(%arg0: i32, %arg1: i32, %arg2: i32) -> (i32, i32) {
    %c0_i32 = arith.constant 0 : i32
    return %arg2, %arg1 : i32, i32
  }
  func.func @transform_2(%arg0: i32, %arg1: i32, %arg2: i32) -> (i32, i32) {
    %c0_i32 = arith.constant 0 : i32
    %c0_i32_0 = arith.constant 0 : i32
    return %c0_i32, %arg1 : i32, i32
  }
  func.func @transform_3(%arg0: i32, %arg1: i32, %arg2: i32) -> (i32, i32) {
    %c0_i32 = arith.constant 0 : i32
    return %arg0, %arg1 : i32, i32
  }
}

module attributes {stable_mosaic.version = 11 : i64} {
  func.func @_matmul_bias_inorm_lrelu_kernel(%arg0: i32, %arg1: i32, %arg2: i32, %arg3: memref<8x512xbf16, #tpu.memory_space<vmem>>, %arg4: memref<512x128xbf16, #tpu.memory_space<vmem>>, %arg5: memref<1x128xf32, #tpu.memory_space<vmem>>, %arg6: memref<8x128xf32, #tpu.memory_space<vmem>>, %arg7: memref<8x128xf32, #tpu.memory_space<vmem>>) attributes {dimension_semantics = [#tpu.dimension_semantics<parallel>, #tpu.dimension_semantics<parallel>, #tpu.dimension_semantics<arbitrary>], iteration_bounds = array<i64: 2, 1, 1>, scalar_prefetch = 0 : i64, scratch_operands = 1 : i64, tpu.core_type = #tpu.core_type<tc>, window_params = [{transform_indices = @transform_0, window_bounds = array<i64: 8, 512>}, {transform_indices = @transform_1, window_bounds = array<i64: 512, 128>}, {transform_indices = @transform_2, window_bounds = array<i64: 1, 128>}, {transform_indices = @transform_3, window_bounds = array<i64: 8, 128>}]} {
    %c0_i32 = arith.constant 0 : i32
    %0 = arith.cmpi eq, %arg2, %c0_i32 : i32
    %1 = arith.extui %0 : i1 to i32
    %c0_i32_0 = arith.constant 0 : i32
    %2 = arith.cmpi ne, %1, %c0_i32_0 : i32
    scf.if %2 {
      %cst_10 = arith.constant 0.000000e+00 : f32
      %12 = vector.broadcast %cst_10 : f32 to vector<8x128xf32>
      %c0_11 = arith.constant 0 : index
      %c0_12 = arith.constant 0 : index
      %13 = vector.load %arg7[%c0_11, %c0_12] : memref<8x128xf32, #tpu.memory_space<vmem>>, vector<8x128xf32>
      tpu.vector_store %arg7[%c0_11, %c0_12], %12 {strides = array<i32>} : memref<8x128xf32, #tpu.memory_space<vmem>>, vector<8x128xf32>,
    } else {
    }
    %c0 = arith.constant 0 : index
    %c0_1 = arith.constant 0 : index
    %3 = vector.load %arg7[%c0, %c0_1] : memref<8x128xf32, #tpu.memory_space<vmem>>, vector<8x128xf32>
    %c0_2 = arith.constant 0 : index
    %c0_3 = arith.constant 0 : index
    %4 = vector.load %arg3[%c0_2, %c0_3] : memref<8x512xbf16, #tpu.memory_space<vmem>>, vector<8x512xbf16>
    %c0_4 = arith.constant 0 : index
    %c0_5 = arith.constant 0 : index
    %5 = vector.load %arg4[%c0_4, %c0_5] : memref<512x128xbf16, #tpu.memory_space<vmem>>, vector<512x128xbf16>
    %cst = arith.constant dense<0.000000e+00> : vector<8x128xf32>
    %6 = tpu.matmul %4, %5, %cst {dimension_numbers = #tpu.dot_dimension_numbers<[1], [0], [0], [1], [0, 0, 1, 1], [], []>} : vector<8x512xbf16>, vector<512x128xbf16>, vector<8x128xf32> -> vector<8x128xf32>
    %7 = arith.addf %3, %6 : vector<8x128xf32>
    %c0_6 = arith.constant 0 : index
    %c0_7 = arith.constant 0 : index
    %8 = vector.load %arg7[%c0_6, %c0_7] : memref<8x128xf32, #tpu.memory_space<vmem>>, vector<8x128xf32>
    tpu.vector_store %arg7[%c0_6, %c0_7], %7 {strides = array<i32>} : memref<8x128xf32, #tpu.memory_space<vmem>>, vector<8x128xf32>,
    %c0_i32_8 = arith.constant 0 : i32
    %9 = arith.cmpi eq, %arg2, %c0_i32_8 : i32
    %10 = arith.extui %9 : i1 to i32
    %c0_i32_9 = arith.constant 0 : i32
    %11 = arith.cmpi ne, %10, %c0_i32_9 : i32
    scf.if %11 {
      %c0_10 = arith.constant 0 : index
      %c0_11 = arith.constant 0 : index
      %12 = vector.load %arg7[%c0_10, %c0_11] : memref<8x128xf32, #tpu.memory_space<vmem>>, vector<8x128xf32>
      %c0_12 = arith.constant 0 : index
      %c0_13 = arith.constant 0 : index
      %13 = vector.load %arg5[%c0_12, %c0_13] : memref<1x128xf32, #tpu.memory_space<vmem>>, vector<1x128xf32>
      %14 = vector.broadcast %13 : vector<1x128xf32> to vector<8x128xf32>
      %15 = arith.addf %12, %14 : vector<8x128xf32>
      %16 = tpu.iota {dimensions = array<i32: 0>} : vector<8x1xi32>
      %c4_i32 = arith.constant 4 : i32
      %17 = vector.broadcast %c4_i32 : i32 to vector<8x1xi32>
      %18 = arith.cmpi slt, %16, %17 : vector<8x1xi32>
      %19 = arith.extui %18 : vector<8x1xi1> to vector<8x1xi32>
      %20 = arith.sitofp %19 : vector<8x1xi32> to vector<8x1xf32>
      %21 = vector.broadcast %20 : vector<8x1xf32> to vector<8x128xf32>
      %22 = arith.mulf %15, %21 : vector<8x128xf32>
      %cst_14 = arith.constant dense<0.000000e+00> : vector<128xf32>
      %23 = vector.multi_reduction <add>, %22, %cst_14 [0] : vector<8x128xf32> to vector<128xf32>
      %24 = vector.shape_cast %23 : vector<128xf32> to vector<1x128xf32>
      %cst_15 = arith.constant 2.500000e-01 : f32
      %25 = vector.broadcast %cst_15 : f32 to vector<1x128xf32>
      %26 = arith.mulf %24, %25 : vector<1x128xf32>
      %27 = vector.broadcast %26 : vector<1x128xf32> to vector<8x128xf32>
      %28 = arith.subf %15, %27 : vector<8x128xf32>
      %29 = arith.mulf %28, %28 : vector<8x128xf32>
      %30 = vector.broadcast %20 : vector<8x1xf32> to vector<8x128xf32>
      %31 = arith.mulf %29, %30 : vector<8x128xf32>
      %cst_16 = arith.constant dense<0.000000e+00> : vector<128xf32>
      %32 = vector.multi_reduction <add>, %31, %cst_16 [0] : vector<8x128xf32> to vector<128xf32>
      %33 = vector.shape_cast %32 : vector<128xf32> to vector<1x128xf32>
      %cst_17 = arith.constant 2.500000e-01 : f32
      %34 = vector.broadcast %cst_17 : f32 to vector<1x128xf32>
      %35 = arith.mulf %33, %34 : vector<1x128xf32>
      %cst_18 = arith.constant 9.99999974E-6 : f32
      %36 = vector.broadcast %cst_18 : f32 to vector<1x128xf32>
      %37 = arith.addf %35, %36 : vector<1x128xf32>
      %38 = math.rsqrt %37 : vector<1x128xf32>
      %39 = vector.broadcast %38 : vector<1x128xf32> to vector<8x128xf32>
      %40 = arith.mulf %28, %39 : vector<8x128xf32>
      %cst_19 = arith.constant 0.000000e+00 : f32
      %41 = vector.broadcast %cst_19 : f32 to vector<8x128xf32>
      %42 = arith.cmpf oge, %40, %41 : vector<8x128xf32>
      %cst_20 = arith.constant 2.000000e-01 : f32
      %43 = vector.broadcast %cst_20 : f32 to vector<8x128xf32>
      %44 = arith.mulf %43, %40 : vector<8x128xf32>
      %45 = arith.select %42, %40, %44 : vector<8x128xi1>, vector<8x128xf32>
      %c0_21 = arith.constant 0 : index
      %c0_22 = arith.constant 0 : index
      %46 = vector.load %arg6[%c0_21, %c0_22] : memref<8x128xf32, #tpu.memory_space<vmem>>, vector<8x128xf32>
      tpu.vector_store %arg6[%c0_21, %c0_22], %45 {strides = array<i32>} : memref<8x128xf32, #tpu.memory_space<vmem>>, vector<8x128xf32>,
    } else {
    }
    return
  }
  func.func @transform_0(%arg0: i32, %arg1: i32, %arg2: i32) -> (i32, i32) {
    %c0_i32 = arith.constant 0 : i32
    return %arg0, %arg2 : i32, i32
  }
  func.func @transform_1(%arg0: i32, %arg1: i32, %arg2: i32) -> (i32, i32) {
    %c0_i32 = arith.constant 0 : i32
    return %arg2, %arg1 : i32, i32
  }
  func.func @transform_2(%arg0: i32, %arg1: i32, %arg2: i32) -> (i32, i32) {
    %c0_i32 = arith.constant 0 : i32
    %c0_i32_0 = arith.constant 0 : i32
    return %c0_i32, %arg1 : i32, i32
  }
  func.func @transform_3(%arg0: i32, %arg1: i32, %arg2: i32) -> (i32, i32) {
    %c0_i32 = arith.constant 0 : i32
    return %arg0, %arg1 : i32, i32
  }
}

module attributes {stable_mosaic.version = 11 : i64} {
  func.func @_matmul_bias_act_kernel(%arg0: i32, %arg1: i32, %arg2: i32, %arg3: memref<8x128xbf16, #tpu.memory_space<vmem>>, %arg4: memref<128x128xbf16, #tpu.memory_space<vmem>>, %arg5: memref<1x128xf32, #tpu.memory_space<vmem>>, %arg6: memref<8x128xf32, #tpu.memory_space<vmem>>, %arg7: memref<8x128xf32, #tpu.memory_space<vmem>>) attributes {dimension_semantics = [#tpu.dimension_semantics<parallel>, #tpu.dimension_semantics<parallel>, #tpu.dimension_semantics<arbitrary>], iteration_bounds = array<i64: 1, 1, 1>, scalar_prefetch = 0 : i64, scratch_operands = 1 : i64, tpu.core_type = #tpu.core_type<tc>, window_params = [{transform_indices = @transform_0, window_bounds = array<i64: 8, 128>}, {transform_indices = @transform_1, window_bounds = array<i64: 128, 128>}, {transform_indices = @transform_2, window_bounds = array<i64: 1, 128>}, {transform_indices = @transform_3, window_bounds = array<i64: 8, 128>}]} {
    %c0_i32 = arith.constant 0 : i32
    %0 = arith.cmpi eq, %arg2, %c0_i32 : i32
    %1 = arith.extui %0 : i1 to i32
    %c0_i32_0 = arith.constant 0 : i32
    %2 = arith.cmpi ne, %1, %c0_i32_0 : i32
    scf.if %2 {
      %cst_10 = arith.constant 0.000000e+00 : f32
      %12 = vector.broadcast %cst_10 : f32 to vector<8x128xf32>
      %c0_11 = arith.constant 0 : index
      %c0_12 = arith.constant 0 : index
      %13 = vector.load %arg7[%c0_11, %c0_12] : memref<8x128xf32, #tpu.memory_space<vmem>>, vector<8x128xf32>
      tpu.vector_store %arg7[%c0_11, %c0_12], %12 {strides = array<i32>} : memref<8x128xf32, #tpu.memory_space<vmem>>, vector<8x128xf32>,
    } else {
    }
    %c0 = arith.constant 0 : index
    %c0_1 = arith.constant 0 : index
    %3 = vector.load %arg7[%c0, %c0_1] : memref<8x128xf32, #tpu.memory_space<vmem>>, vector<8x128xf32>
    %c0_2 = arith.constant 0 : index
    %c0_3 = arith.constant 0 : index
    %4 = vector.load %arg3[%c0_2, %c0_3] : memref<8x128xbf16, #tpu.memory_space<vmem>>, vector<8x128xbf16>
    %c0_4 = arith.constant 0 : index
    %c0_5 = arith.constant 0 : index
    %5 = vector.load %arg4[%c0_4, %c0_5] : memref<128x128xbf16, #tpu.memory_space<vmem>>, vector<128x128xbf16>
    %cst = arith.constant dense<0.000000e+00> : vector<8x128xf32>
    %6 = tpu.matmul %4, %5, %cst {dimension_numbers = #tpu.dot_dimension_numbers<[1], [0], [0], [1], [0, 0, 1, 1], [], []>} : vector<8x128xbf16>, vector<128x128xbf16>, vector<8x128xf32> -> vector<8x128xf32>
    %7 = arith.addf %3, %6 : vector<8x128xf32>
    %c0_6 = arith.constant 0 : index
    %c0_7 = arith.constant 0 : index
    %8 = vector.load %arg7[%c0_6, %c0_7] : memref<8x128xf32, #tpu.memory_space<vmem>>, vector<8x128xf32>
    tpu.vector_store %arg7[%c0_6, %c0_7], %7 {strides = array<i32>} : memref<8x128xf32, #tpu.memory_space<vmem>>, vector<8x128xf32>,
    %c0_i32_8 = arith.constant 0 : i32
    %9 = arith.cmpi eq, %arg2, %c0_i32_8 : i32
    %10 = arith.extui %9 : i1 to i32
    %c0_i32_9 = arith.constant 0 : i32
    %11 = arith.cmpi ne, %10, %c0_i32_9 : i32
    scf.if %11 {
      %c0_10 = arith.constant 0 : index
      %c0_11 = arith.constant 0 : index
      %12 = vector.load %arg7[%c0_10, %c0_11] : memref<8x128xf32, #tpu.memory_space<vmem>>, vector<8x128xf32>
      %c0_12 = arith.constant 0 : index
      %c0_13 = arith.constant 0 : index
      %13 = vector.load %arg5[%c0_12, %c0_13] : memref<1x128xf32, #tpu.memory_space<vmem>>, vector<1x128xf32>
      %14 = vector.broadcast %13 : vector<1x128xf32> to vector<8x128xf32>
      %15 = arith.addf %12, %14 : vector<8x128xf32>
      %c0_14 = arith.constant 0 : index
      %c0_15 = arith.constant 0 : index
      %16 = vector.load %arg6[%c0_14, %c0_15] : memref<8x128xf32, #tpu.memory_space<vmem>>, vector<8x128xf32>
      tpu.vector_store %arg6[%c0_14, %c0_15], %15 {strides = array<i32>} : memref<8x128xf32, #tpu.memory_space<vmem>>, vector<8x128xf32>,
    } else {
    }
    return
  }
  func.func @transform_0(%arg0: i32, %arg1: i32, %arg2: i32) -> (i32, i32) {
    %c0_i32 = arith.constant 0 : i32
    return %arg0, %arg2 : i32, i32
  }
  func.func @transform_1(%arg0: i32, %arg1: i32, %arg2: i32) -> (i32, i32) {
    %c0_i32 = arith.constant 0 : i32
    return %arg2, %arg1 : i32, i32
  }
  func.func @transform_2(%arg0: i32, %arg1: i32, %arg2: i32) -> (i32, i32) {
    %c0_i32 = arith.constant 0 : i32
    %c0_i32_0 = arith.constant 0 : i32
    return %c0_i32, %arg1 : i32, i32
  }
  func.func @transform_3(%arg0: i32, %arg1: i32, %arg2: i32) -> (i32, i32) {
    %c0_i32 = arith.constant 0 : i32
    return %arg0, %arg1 : i32, i32
  }
}

</mosaic_0001>

<bundles_post_ra>
// kernel: discriminator_forward.5
= control target key start
LH: loop header
LB: loop body
LE: loop exit
PB: predicated region body
PF: predicated region fallthrough
CT: control target
= control target key end

     0   :  { %v1508_v0 = vmov 0   ;;  %s2062_s1 = inlined_call_operand.vmem [shape: bf16[256,128], index: 1, kind: input, shape index: {}]   ;;  %s2063_s0 = inlined_call_operand.vmem [shape: bf16[512,256], index: 0, kind: input, shape index: {}]   ;;  %s2064_s2 = inlined_call_operand.vmem [shape: f32[1,128], index: 2, kind: input, shape index: {}]   ;;  %s2065_s3 = inlined_call_operand.vmem [shape: f32[512,128], index: 3, kind: output, shape index: {}]  }
   0x1   :  { %659 = vmatprep.subr.bf16.mxu0 %v1508_v0  ;;  %1363 = vmatprep.subr.bf16.mxu1 %v1508_v0  ;;  %v1396_v1 = vld [vmem:[%s2062_s1] sm:$0xff]   ;;  %v1397_v2 = vld [vmem:[%s2062_s1 + $0x8] sm:$0xff]   ;;  %v1398_v3 = vld [vmem:[%s2062_s1 + $0x10] sm:$0xff]  }
   0x2   :  { %660 = vmatpush1.bf16.msra.mxu0 %v1396_v1  ;;  %1379 = vmatpush1.bf16.msra.mxu1 %v1396_v1  ;;  %v1399_v4 = vld [vmem:[%s2062_s1 + $0x18] sm:$0xff]   ;;  %v1400_v5 = vld [vmem:[%s2062_s1 + $0x20] sm:$0xff]   ;;  %v1401_v7 = vld [vmem:[%s2062_s1 + $0x28] sm:$0xff]  }
   0x3   :  { %661 = vmatprep.subr.bf16.mxu0 %v1508_v0  ;;  %1364 = vmatprep.subr.bf16.mxu1 %v1508_v0  ;;  %v1414_v6 = vld [vmem:[%s2063_s0 + $0x4] ss:$8 sps:$4 sm:$0xff]   ;;  %v1402_v9 = vld [vmem:[%s2062_s1 + $0x30] sm:$0xff]   ;;  %v1403_v10 = vld [vmem:[%s2062_s1 + $0x38] sm:$0xff]  }
   0x4   :  { %v1417_v8 = vld [vmem:[%s2063_s0 + $0x104] ss:$8 sps:$4 sm:$0xff]   ;;  %691 = vmatprep.mubr.bf16.mxu0 %v1414_v6  ;;  %v1406_v13 = vld [vmem:[%s2062_s1 + $0x50] sm:$0xff]   ;;  %v1407_v14 = vld [vmem:[%s2062_s1 + $0x58] sm:$0xff]  }
   0x5   :  { %819 = vmatprep.mubr.bf16.mxu1 %v1417_v8  ;;  %v1404_v11 = vld [vmem:[%s2062_s1 + $0x40] sm:$0xff]   ;;  %v1405_v12 = vld [vmem:[%s2062_s1 + $0x48] sm:$0xff]   ;;  %v1410_v17 = vld [vmem:[%s2062_s1 + $0x70] sm:$0xff]  }
   0x6   :  { %662 = vmatpush1.bf16.msra.mxu0 %v1397_v2  ;;  %1380 = vmatpush1.bf16.msra.mxu1 %v1397_v2  ;;  %v1408_v15 = vld [vmem:[%s2062_s1 + $0x60] sm:$0xff]   ;;  %v1409_v16 = vld [vmem:[%s2062_s1 + $0x68] sm:$0xff]   ;;  %v1411_v18 = vld [vmem:[%s2062_s1 + $0x78] sm:$0xff]  }
   0x7   :  { %663 = vmatprep.subr.bf16.mxu0 %v1508_v0  ;;  %1365 = vmatprep.subr.bf16.mxu1 %v1508_v0  ;;  %v1412_v19 = vld [vmem:[%s2063_s0] ss:$8 sps:$4 sm:$0xff]   ;;  %v1418_v21 = vld [vmem:[%s2063_s0 + $0x14] ss:$8 sps:$4 sm:$0xff]   ;;  %v1422_v23 = vld [vmem:[%s2063_s0 + $0x10] ss:$8 sps:$4 sm:$0xff]  }
   0x8   :  { %v1415_v20 = vld [vmem:[%s2063_s0 + $0x100] ss:$8 sps:$4 sm:$0xff]   ;;  %v1420_v22 = vld [vmem:[%s2063_s0 + $0x114] ss:$8 sps:$4 sm:$0xff]   ;;  %v1423_v24 = vld [vmem:[%s2063_s0 + $0x110] ss:$8 sps:$4 sm:$0xff]  }
   0x9   :  { %v1424_v25 = vld [vmem:[%s2063_s0 + $0x24] ss:$8 sps:$4 sm:$0xff]   ;;  %v1428_v27 = vld [vmem:[%s2063_s0 + $0x20] ss:$8 sps:$4 sm:$0xff]   ;;  %v1430_v29 = vld [vmem:[%s2063_s0 + $0x34] ss:$8 sps:$4 sm:$0xff]  }
   0xa   :  { %664 = vmatpush1.bf16.msra.mxu0 %v1398_v3  ;;  %1381 = vmatpush1.bf16.msra.mxu1 %v1398_v3  ;;  %v1426_v26 = vld [vmem:[%s2063_s0 + $0x124] ss:$8 sps:$4 sm:$0xff]   ;;  %v1429_v28 = vld [vmem:[%s2063_s0 + $0x120] ss:$8 sps:$4 sm:$0xff]   ;;  %v1432_v30 = vld [vmem:[%s2063_s0 + $0x134] ss:$8 sps:$4 sm:$0xff]  }
   0xb   :  { %665 = vmatprep.subr.bf16.mxu0 %v1508_v0  ;;  %1366 = vmatprep.subr.bf16.mxu1 %v1508_v0  ;;  %v1434_v31 = vld [vmem:[%s2063_s0 + $0x30] ss:$8 sps:$4 sm:$0xff]   ;;  %v1436_v33 = vld [vmem:[%s2063_s0 + $0x44] ss:$8 sps:$4 sm:$0xff]   ;;  %v1440_v35 = vld [vmem:[%s2063_s0 + $0x40] ss:$8 sps:$4 sm:$0xff]  }
   0xc   :  { %v1435_v32 = vld [vmem:[%s2063_s0 + $0x130] ss:$8 sps:$4 sm:$0xff]   ;;  %v1438_v34 = vld [vmem:[%s2063_s0 + $0x144] ss:$8 sps:$4 sm:$0xff]   ;;  %v1441_v36 = vld [vmem:[%s2063_s0 + $0x140] ss:$8 sps:$4 sm:$0xff]  }
   0xd   :  { %v1442_v37 = vld [vmem:[%s2063_s0 + $0x54] ss:$8 sps:$4 sm:$0xff]   ;;  %v1446_v39 = vld [vmem:[%s2063_s0 + $0x50] ss:$8 sps:$4 sm:$0xff]   ;;  %v1448_v41 = vld [vmem:[%s2063_s0 + $0x64] ss:$8 sps:$4 sm:$0xff]  }
   0xe   :  { %666 = vmatpush1.bf16.msra.mxu0 %v1399_v4  ;;  %1382 = vmatpush1.bf16.msra.mxu1 %v1399_v4  ;;  %v1444_v38 = vld [vmem:[%s2063_s0 + $0x154] ss:$8 sps:$4 sm:$0xff]   ;;  %v1447_v40 = vld [vmem:[%s2063_s0 + $0x150] ss:$8 sps:$4 sm:$0xff]   ;;  %v1450_v42 = vld [vmem:[%s2063_s0 + $0x164] ss:$8 sps:$4 sm:$0xff]  }
   0xf   :  { %667 = vmatprep.subr.bf16.mxu0 %v1508_v0  ;;  %1367 = vmatprep.subr.bf16.mxu1 %v1508_v0  ;;  %v1452_v43 = vld [vmem:[%s2063_s0 + $0x60] ss:$8 sps:$4 sm:$0xff]   ;;  %v1454_v45 = vld [vmem:[%s2063_s0 + $0x74] ss:$8 sps:$4 sm:$0xff]   ;;  %v1458_v47 = vld [vmem:[%s2063_s0 + $0x70] ss:$8 sps:$4 sm:$0xff]  }
  0x10   :  { %v1453_v44 = vld [vmem:[%s2063_s0 + $0x160] ss:$8 sps:$4 sm:$0xff]   ;;  %v1456_v46 = vld [vmem:[%s2063_s0 + $0x174] ss:$8 sps:$4 sm:$0xff]   ;;  %v1459_v48 = vld [vmem:[%s2063_s0 + $0x170] ss:$8 sps:$4 sm:$0xff]  }
  0x11   :  { %v1460_v49 = vld [vmem:[%s2063_s0 + $0x84] ss:$8 sps:$4 sm:$0xff]   ;;  %v1464_v51 = vld [vmem:[%s2063_s0 + $0x80] ss:$8 sps:$4 sm:$0xff]   ;;  %v1466_v53 = vld [vmem:[%s2063_s0 + $0x94] ss:$8 sps:$4 sm:$0xff]  }
  0x12   :  { %668 = vmatpush1.bf16.msra.mxu0 %v1400_v5  ;;  %1383 = vmatpush1.bf16.msra.mxu1 %v1400_v5  ;;  %v1462_v50 = vld [vmem:[%s2063_s0 + $0x184] ss:$8 sps:$4 sm:$0xff]   ;;  %v1465_v52 = vld [vmem:[%s2063_s0 + $0x180] ss:$8 sps:$4 sm:$0xff]   ;;  %v1468_v54 = vld [vmem:[%s2063_s0 + $0x194] ss:$8 sps:$4 sm:$0xff]  }
  0x13   :  { %669 = vmatprep.subr.bf16.mxu0 %v1508_v0  ;;  %1368 = vmatprep.subr.bf16.mxu1 %v1508_v0  ;;  %v1470_v55 = vld [vmem:[%s2063_s0 + $0x90] ss:$8 sps:$4 sm:$0xff]   ;;  %v1472_v57 = vld [vmem:[%s2063_s0 + $0xa4] ss:$8 sps:$4 sm:$0xff]   ;;  %v1476_v59 = vld [vmem:[%s2063_s0 + $0xa0] ss:$8 sps:$4 sm:$0xff]  }
  0x14   :  { %v1471_v56 = vld [vmem:[%s2063_s0 + $0x190] ss:$8 sps:$4 sm:$0xff]   ;;  %v1474_v58 = vld [vmem:[%s2063_s0 + $0x1a4] ss:$8 sps:$4 sm:$0xff]   ;;  %v1477_v60 = vld [vmem:[%s2063_s0 + $0x1a0] ss:$8 sps:$4 sm:$0xff]  }
  0x15   :  { %v1478_v61 = vld [vmem:[%s2063_s0 + $0xb4] ss:$8 sps:$4 sm:$0xff]   ;;  %v1482_v63 = vld [vmem:[%s2063_s0 + $0xb0] ss:$8 sps:$4 sm:$0xff]   ;;  %v1484_v1 = vld [vmem:[%s2063_s0 + $0xc4] ss:$8 sps:$4 sm:$0xff]  }
  0x16   :  { %670 = vmatpush1.bf16.msra.mxu0 %v1401_v7  ;;  %1384 = vmatpush1.bf16.msra.mxu1 %v1401_v7  ;;  %v1480_v62 = vld [vmem:[%s2063_s0 + $0x1b4] ss:$8 sps:$4 sm:$0xff]   ;;  %v1486_v2 = vld [vmem:[%s2063_s0 + $0x1c4] ss:$8 sps:$4 sm:$0xff]   ;;  %v1488_v3 = vld [vmem:[%s2063_s0 + $0xc0] ss:$8 sps:$4 sm:$0xff]  }
  0x17   :  { %671 = vmatprep.subr.bf16.mxu0 %v1508_v0  ;;  %1369 = vmatprep.subr.bf16.mxu1 %v1508_v0  ;;  %v1489_v4 = vld [vmem:[%s2063_s0 + $0x1c0] ss:$8 sps:$4 sm:$0xff]   ;;  %v1490_v5 = vld [vmem:[%s2063_s0 + $0xd4] ss:$8 sps:$4 sm:$0xff]   ;;  %v1494_v7 = vld [vmem:[%s2063_s0 + $0xd0] ss:$8 sps:$4 sm:$0xff]  }
  0x18   :  { %v1492_v6 = vld [vmem:[%s2063_s0 + $0x1d4] ss:$8 sps:$4 sm:$0xff]   ;;  %v1495_v8 = vld [vmem:[%s2063_s0 + $0x1d0] ss:$8 sps:$4 sm:$0xff]  }
  0x1a   :  { %672 = vmatpush1.bf16.msra.mxu0 %v1402_v9  ;;  %1385 = vmatpush1.bf16.msra.mxu1 %v1402_v9  ;;  %v1496_v9 = vld [vmem:[%s2063_s0 + $0xe4] ss:$8 sps:$4 sm:$0xff]  }
  0x1b   :  { %673 = vmatprep.subr.bf16.mxu0 %v1508_v0  ;;  %1370 = vmatprep.subr.bf16.mxu1 %v1508_v0 }
  0x1e   :  { %674 = vmatpush1.bf16.msra.mxu0 %v1403_v10  ;;  %1386 = vmatpush1.bf16.msra.mxu1 %v1403_v10  ;;  %v1498_v10 = vld [vmem:[%s2063_s0 + $0x1e4] ss:$8 sps:$4 sm:$0xff]  }
  0x1f   :  { %675 = vmatprep.subr.bf16.mxu0 %v1508_v0  ;;  %1371 = vmatprep.subr.bf16.mxu1 %v1508_v0 }
  0x22   :  { %676 = vmatpush1.bf16.msra.mxu0 %v1404_v11  ;;  %1387 = vmatpush1.bf16.msra.mxu1 %v1404_v11  ;;  %v1500_v11 = vld [vmem:[%s2063_s0 + $0xe0] ss:$8 sps:$4 sm:$0xff]  }
  0x23   :  { %677 = vmatprep.subr.bf16.mxu0 %v1508_v0  ;;  %1372 = vmatprep.subr.bf16.mxu1 %v1508_v0 }
  0x26   :  { %678 = vmatpush1.bf16.msra.mxu0 %v1405_v12  ;;  %1388 = vmatpush1.bf16.msra.mxu1 %v1405_v12  ;;  %v1501_v12 = vld [vmem:[%s2063_s0 + $0x1e0] ss:$8 sps:$4 sm:$0xff]  }
  0x27   :  { %679 = vmatprep.subr.bf16.mxu0 %v1508_v0  ;;  %1373 = vmatprep.subr.bf16.mxu1 %v1508_v0 }
  0x2a   :  { %680 = vmatpush1.bf16.msra.mxu0 %v1406_v13  ;;  %1389 = vmatpush1.bf16.msra.mxu1 %v1406_v13  ;;  %v1502_v13 = vld [vmem:[%s2063_s0 + $0xf4] ss:$8 sps:$4 sm:$0xff]  }
  0x2b   :  { %681 = vmatprep.subr.bf16.mxu0 %v1508_v0  ;;  %1374 = vmatprep.subr.bf16.mxu1 %v1508_v0 }
  0x2e   :  { %682 = vmatpush1.bf16.msra.mxu0 %v1407_v14  ;;  %1390 = vmatpush1.bf16.msra.mxu1 %v1407_v14  ;;  %v1504_v14 = vld [vmem:[%s2063_s0 + $0x1f4] ss:$8 sps:$4 sm:$0xff]  }
  0x2f   :  { %683 = vmatprep.subr.bf16.mxu0 %v1508_v0  ;;  %1375 = vmatprep.subr.bf16.mxu1 %v1508_v0 }
  0x32   :  { %684 = vmatpush1.bf16.msra.mxu0 %v1408_v15  ;;  %1391 = vmatpush1.bf16.msra.mxu1 %v1408_v15  ;;  %v1506_v15 = vld [vmem:[%s2063_s0 + $0xf0] ss:$8 sps:$4 sm:$0xff]  }
  0x33   :  { %685 = vmatprep.subr.bf16.mxu0 %v1508_v0  ;;  %1376 = vmatprep.subr.bf16.mxu1 %v1508_v0 }
  0x36   :  { %686 = vmatpush1.bf16.msra.mxu0 %v1409_v16  ;;  %1392 = vmatpush1.bf16.msra.mxu1 %v1409_v16  ;;  %v1507_v16 = vld [vmem:[%s2063_s0 + $0x1f0] ss:$8 sps:$4 sm:$0xff]  }
  0x37   :  { %687 = vmatprep.subr.bf16.mxu0 %v1508_v0  ;;  %1377 = vmatprep.subr.bf16.mxu1 %v1508_v0 }
  0x3a   :  { %688 = vmatpush1.bf16.msra.mxu0 %v1410_v17  ;;  %1393 = vmatpush1.bf16.msra.mxu1 %v1410_v17  ;;  %v1804_v17 = vld [vmem:[%s2064_s2] ss:$0 sm:$0xff] }
  0x3b   :  { %689 = vmatprep.subr.bf16.mxu0 %v1508_v0  ;;  %1378 = vmatprep.subr.bf16.mxu1 %v1508_v0  ;;  %v1483_v0 = vld [vmem:[%s2063_s0 + $0x1b0] ss:$8 sps:$4 sm:$0xff]  }
  0x3e   :  { %690 = vmatpush1.bf16.msra.mxu0 %v1411_v18  ;;  %1394 = vmatpush1.bf16.msra.mxu1 %v1411_v18 }
  0x41   :  { %692 = vmatmul.mubr.bf16.vlgmr.msra.gmra.mrb[0].mxu0 %v1412_v19  ;;  %820 = vmatmul.mubr.bf16.vlgmr.msra.gmra.mrb[0].mxu1 %v1415_v20 }
  0x42   :  { %699 = vmatprep.mubr.bf16.mxu0 %v1418_v21  ;;  %827 = vmatprep.mubr.bf16.mxu1 %v1420_v22 }
  0x49   :  { %700 = vmatmul.mubr.bf16.gmra.mrb[4].mxu0 %v1422_v23  ;;  %828 = vmatmul.mubr.bf16.gmra.mrb[4].mxu1 %v1423_v24 }
  0x4a   :  { %707 = vmatprep.mubr.bf16.mxu0 %v1424_v25  ;;  %835 = vmatprep.mubr.bf16.mxu1 %v1426_v26 }
  0x51   :  { %708 = vmatmul.mubr.bf16.gmra.mrb[8].mxu0 %v1428_v27  ;;  %836 = vmatmul.mubr.bf16.gmra.mrb[8].mxu1 %v1429_v28 }
  0x52   :  { %715 = vmatprep.mubr.bf16.mxu0 %v1430_v29  ;;  %843 = vmatprep.mubr.bf16.mxu1 %v1432_v30 }
  0x59   :  { %716 = vmatmul.mubr.bf16.gmra.mrb[12].mxu0 %v1434_v31  ;;  %844 = vmatmul.mubr.bf16.gmra.mrb[12].mxu1 %v1435_v32 }
  0x5a   :  { %723 = vmatprep.mubr.bf16.mxu0 %v1436_v33  ;;  %851 = vmatprep.mubr.bf16.mxu1 %v1438_v34 }
  0x61   :  { %724 = vmatmul.mubr.bf16.gmra.mrb[16].mxu0 %v1440_v35  ;;  %852 = vmatmul.mubr.bf16.gmra.mrb[16].mxu1 %v1441_v36 }
  0x62   :  { %731 = vmatprep.mubr.bf16.mxu0 %v1442_v37  ;;  %859 = vmatprep.mubr.bf16.mxu1 %v1444_v38 }
  0x69   :  { %732 = vmatmul.mubr.bf16.gmra.mrb[20].mxu0 %v1446_v39  ;;  %860 = vmatmul.mubr.bf16.gmra.mrb[20].mxu1 %v1447_v40 }
  0x6a   :  { %739 = vmatprep.mubr.bf16.mxu0 %v1448_v41  ;;  %867 = vmatprep.mubr.bf16.mxu1 %v1450_v42 }
  0x71   :  { %740 = vmatmul.mubr.bf16.gmra.mrb[24].mxu0 %v1452_v43  ;;  %868 = vmatmul.mubr.bf16.gmra.mrb[24].mxu1 %v1453_v44 }
  0x72   :  { %747 = vmatprep.mubr.bf16.mxu0 %v1454_v45  ;;  %875 = vmatprep.mubr.bf16.mxu1 %v1456_v46 }
  0x79   :  { %748 = vmatmul.mubr.bf16.gmra.mrb[28].mxu0 %v1458_v47  ;;  %876 = vmatmul.mubr.bf16.gmra.mrb[28].mxu1 %v1459_v48 }
  0x7a   :  { %755 = vmatprep.mubr.bf16.mxu0 %v1460_v49  ;;  %883 = vmatprep.mubr.bf16.mxu1 %v1462_v50 }
  0x81   :  { %756 = vmatmul.mubr.bf16.gmra.mrb[32].mxu0 %v1464_v51  ;;  %884 = vmatmul.mubr.bf16.gmra.mrb[32].mxu1 %v1465_v52 }
  0x82   :  { %763 = vmatprep.mubr.bf16.mxu0 %v1466_v53  ;;  %891 = vmatprep.mubr.bf16.mxu1 %v1468_v54 }
  0x89   :  { %764 = vmatmul.mubr.bf16.gmra.mrb[36].mxu0 %v1470_v55  ;;  %892 = vmatmul.mubr.bf16.gmra.mrb[36].mxu1 %v1471_v56 }
  0x8a   :  { %771 = vmatprep.mubr.bf16.mxu0 %v1472_v57  ;;  %899 = vmatprep.mubr.bf16.mxu1 %v1474_v58 }
  0x91   :  { %772 = vmatmul.mubr.bf16.gmra.mrb[40].mxu0 %v1476_v59  ;;  %900 = vmatmul.mubr.bf16.gmra.mrb[40].mxu1 %v1477_v60 }
  0x92   :  { %779 = vmatprep.mubr.bf16.mxu0 %v1478_v61  ;;  %907 = vmatprep.mubr.bf16.mxu1 %v1480_v62 }
  0x99   :  { %780 = vmatmul.mubr.bf16.gmra.mrb[44].mxu0 %v1482_v63  ;;  %908 = vmatmul.mubr.bf16.gmra.mrb[44].mxu1 %v1483_v0 }
  0x9a   :  { %787 = vmatprep.mubr.bf16.mxu0 %v1484_v1  ;;  %915 = vmatprep.mubr.bf16.mxu1 %v1486_v2 }
  0xa1   :  { %788 = vmatmul.mubr.bf16.gmra.mrb[48].mxu0 %v1488_v3  ;;  %916 = vmatmul.mubr.bf16.gmra.mrb[48].mxu1 %v1489_v4 }
  0xa2   :  { %795 = vmatprep.mubr.bf16.mxu0 %v1490_v5  ;;  %923 = vmatprep.mubr.bf16.mxu1 %v1492_v6 }
  0xa9   :  { %796 = vmatmul.mubr.bf16.gmra.mrb[52].mxu0 %v1494_v7  ;;  %924 = vmatmul.mubr.bf16.gmra.mrb[52].mxu1 %v1495_v8 }
  0xaa   :  { %803 = vmatprep.mubr.bf16.mxu0 %v1496_v9  ;;  %931 = vmatprep.mubr.bf16.mxu1 %v1498_v10 }
  0xb1   :  { %804 = vmatmul.mubr.bf16.gmra.mrb[56].mxu0 %v1500_v11  ;;  %932 = vmatmul.mubr.bf16.gmra.mrb[56].mxu1 %v1501_v12 }
  0xb2   :  { %811 = vmatprep.mubr.bf16.mxu0 %v1502_v13  ;;  %939 = vmatprep.mubr.bf16.mxu1 %v1504_v14 }
  0xb9   :  { %812 = vmatmul.mubr.bf16.gmra.mrb[60].mxu0 %v1506_v15  ;;  %940 = vmatmul.mubr.bf16.gmra.mrb[60].mxu1 %v1507_v16 }
 0x114   :  { %v693_v18 = vpop.f32.mrb[0].mxu0  ;;  %v821_v19 = vpop.f32.mrb[0].mxu1 }
 0x115   :  { %v1150_v20 = vadd.f32 %v1804_v17, %v693_v18  ;;  %v1182_v21 = vadd.f32 %v1804_v17, %v821_v19  ;;  %v695_v22 = vpop.f32.mrb[1].mxu0  ;;  %v823_v23 = vpop.f32.mrb[1].mxu1 }
 0x116   :  { %v696_v24 = vpop.f32.mrb[2].mxu0  ;;  %v824_v25 = vpop.f32.mrb[2].mxu1 }
 0x117   :  { %1214 = vst [vmem:[%s2065_s3] sm:$0xff] %v1150_v20  ;;  %1246 = vst [vmem:[%s2065_s3 + $0x100] sm:$0xff] %v1182_v21  ;;  %v1151_v26 = vadd.f32 %v1804_v17, %v696_v24  ;;  %v1183_v27 = vadd.f32 %v1804_v17, %v824_v25  ;;  %v698_v28 = vpop.f32.mrb[3].mxu0  ;;  %v826_v29 = vpop.f32.mrb[3].mxu1 }
 0x119   :  { %1215 = vst [vmem:[%s2065_s3 + $0x8] sm:$0xff] %v1151_v26  ;;  %1247 = vst [vmem:[%s2065_s3 + $0x108] sm:$0xff] %v1183_v27 }
 0x11c   :  { %v701_v30 = vpop.f32.mrb[4].mxu0  ;;  %v829_v31 = vpop.f32.mrb[4].mxu1 }
 0x11d   :  { %v1152_v32 = vadd.f32 %v1804_v17, %v701_v30  ;;  %v1184_v33 = vadd.f32 %v1804_v17, %v829_v31  ;;  %v703_v34 = vpop.f32.mrb[5].mxu0  ;;  %v831_v35 = vpop.f32.mrb[5].mxu1 }
 0x11e   :  { %v704_v36 = vpop.f32.mrb[6].mxu0  ;;  %v832_v37 = vpop.f32.mrb[6].mxu1 }
 0x11f   :  { %1216 = vst [vmem:[%s2065_s3 + $0x10] sm:$0xff] %v1152_v32  ;;  %1248 = vst [vmem:[%s2065_s3 + $0x110] sm:$0xff] %v1184_v33  ;;  %v1153_v38 = vadd.f32 %v1804_v17, %v704_v36  ;;  %v1185_v39 = vadd.f32 %v1804_v17, %v832_v37  ;;  %v706_v40 = vpop.f32.mrb[7].mxu0  ;;  %v834_v41 = vpop.f32.mrb[7].mxu1 }
 0x121   :  { %1217 = vst [vmem:[%s2065_s3 + $0x18] sm:$0xff] %v1153_v38  ;;  %1249 = vst [vmem:[%s2065_s3 + $0x118] sm:$0xff] %v1185_v39 }
 0x124   :  { %v709_v42 = vpop.f32.mrb[8].mxu0  ;;  %v837_v43 = vpop.f32.mrb[8].mxu1 }
 0x125   :  { %v1154_v44 = vadd.f32 %v1804_v17, %v709_v42  ;;  %v1186_v45 = vadd.f32 %v1804_v17, %v837_v43  ;;  %v711_v46 = vpop.f32.mrb[9].mxu0  ;;  %v839_v47 = vpop.f32.mrb[9].mxu1 }
 0x126   :  { %v712_v48 = vpop.f32.mrb[10].mxu0  ;;  %v840_v49 = vpop.f32.mrb[10].mxu1 }
 0x127   :  { %1218 = vst [vmem:[%s2065_s3 + $0x20] sm:$0xff] %v1154_v44  ;;  %1250 = vst [vmem:[%s2065_s3 + $0x120] sm:$0xff] %v1186_v45  ;;  %v1155_v50 = vadd.f32 %v1804_v17, %v712_v48  ;;  %v1187_v51 = vadd.f32 %v1804_v17, %v840_v49  ;;  %v714_v52 = vpop.f32.mrb[11].mxu0  ;;  %v842_v53 = vpop.f32.mrb[11].mxu1 }
 0x129   :  { %1219 = vst [vmem:[%s2065_s3 + $0x28] sm:$0xff] %v1155_v50  ;;  %1251 = vst [vmem:[%s2065_s3 + $0x128] sm:$0xff] %v1187_v51 }
 0x12c   :  { %v717_v54 = vpop.f32.mrb[12].mxu0  ;;  %v845_v55 = vpop.f32.mrb[12].mxu1 }
 0x12d   :  { %v1156_v56 = vadd.f32 %v1804_v17, %v717_v54  ;;  %v1188_v57 = vadd.f32 %v1804_v17, %v845_v55  ;;  %v719_v58 = vpop.f32.mrb[13].mxu0  ;;  %v847_v59 = vpop.f32.mrb[13].mxu1 }
 0x12e   :  { %v720_v60 = vpop.f32.mrb[14].mxu0  ;;  %v848_v61 = vpop.f32.mrb[14].mxu1 }
 0x12f   :  { %1220 = vst [vmem:[%s2065_s3 + $0x30] sm:$0xff] %v1156_v56  ;;  %1252 = vst [vmem:[%s2065_s3 + $0x130] sm:$0xff] %v1188_v57  ;;  %v1157_v62 = vadd.f32 %v1804_v17, %v720_v60  ;;  %v1189_v63 = vadd.f32 %v1804_v17, %v848_v61  ;;  %v722_v0 = vpop.f32.mrb[15].mxu0  ;;  %v850_v1 = vpop.f32.mrb[15].mxu1 }
 0x131   :  { %1221 = vst [vmem:[%s2065_s3 + $0x38] sm:$0xff] %v1157_v62  ;;  %1253 = vst [vmem:[%s2065_s3 + $0x138] sm:$0xff] %v1189_v63 }
 0x134   :  { %v725_v2 = vpop.f32.mrb[16].mxu0  ;;  %v853_v3 = vpop.f32.mrb[16].mxu1 }
 0x135   :  { %v1158_v4 = vadd.f32 %v1804_v17, %v725_v2  ;;  %v1190_v5 = vadd.f32 %v1804_v17, %v853_v3  ;;  %v727_v6 = vpop.f32.mrb[17].mxu0  ;;  %v855_v7 = vpop.f32.mrb[17].mxu1 }
 0x136   :  { %v728_v8 = vpop.f32.mrb[18].mxu0  ;;  %v856_v9 = vpop.f32.mrb[18].mxu1 }
 0x137   :  { %1222 = vst [vmem:[%s2065_s3 + $0x40] sm:$0xff] %v1158_v4  ;;  %1254 = vst [vmem:[%s2065_s3 + $0x140] sm:$0xff] %v1190_v5  ;;  %v1159_v10 = vadd.f32 %v1804_v17, %v728_v8  ;;  %v1191_v11 = vadd.f32 %v1804_v17, %v856_v9  ;;  %v730_v12 = vpop.f32.mrb[19].mxu0  ;;  %v858_v13 = vpop.f32.mrb[19].mxu1 }
 0x139   :  { %1223 = vst [vmem:[%s2065_s3 + $0x48] sm:$0xff] %v1159_v10  ;;  %1255 = vst [vmem:[%s2065_s3 + $0x148] sm:$0xff] %v1191_v11 }
 0x13c   :  { %v733_v14 = vpop.f32.mrb[20].mxu0  ;;  %v861_v15 = vpop.f32.mrb[20].mxu1 }
 0x13d   :  { %v1160_v16 = vadd.f32 %v1804_v17, %v733_v14  ;;  %v1192_v18 = vadd.f32 %v1804_v17, %v861_v15  ;;  %v735_v19 = vpop.f32.mrb[21].mxu0  ;;  %v863_v20 = vpop.f32.mrb[21].mxu1 }
 0x13e   :  { %v736_v21 = vpop.f32.mrb[22].mxu0  ;;  %v864_v22 = vpop.f32.mrb[22].mxu1 }
 0x13f   :  { %1224 = vst [vmem:[%s2065_s3 + $0x50] sm:$0xff] %v1160_v16  ;;  %1256 = vst [vmem:[%s2065_s3 + $0x150] sm:$0xff] %v1192_v18  ;;  %v1161_v23 = vadd.f32 %v1804_v17, %v736_v21  ;;  %v1193_v24 = vadd.f32 %v1804_v17, %v864_v22  ;;  %v738_v25 = vpop.f32.mrb[23].mxu0  ;;  %v866_v26 = vpop.f32.mrb[23].mxu1 }
 0x141   :  { %1225 = vst [vmem:[%s2065_s3 + $0x58] sm:$0xff] %v1161_v23  ;;  %1257 = vst [vmem:[%s2065_s3 + $0x158] sm:$0xff] %v1193_v24 }
 0x144   :  { %v741_v27 = vpop.f32.mrb[24].mxu0  ;;  %v869_v28 = vpop.f32.mrb[24].mxu1 }
 0x145   :  { %v1162_v29 = vadd.f32 %v1804_v17, %v741_v27  ;;  %v1194_v30 = vadd.f32 %v1804_v17, %v869_v28  ;;  %v743_v31 = vpop.f32.mrb[25].mxu0  ;;  %v871_v32 = vpop.f32.mrb[25].mxu1 }
 0x146   :  { %v744_v33 = vpop.f32.mrb[26].mxu0  ;;  %v872_v34 = vpop.f32.mrb[26].mxu1 }
 0x147   :  { %1226 = vst [vmem:[%s2065_s3 + $0x60] sm:$0xff] %v1162_v29  ;;  %1258 = vst [vmem:[%s2065_s3 + $0x160] sm:$0xff] %v1194_v30  ;;  %v1163_v35 = vadd.f32 %v1804_v17, %v744_v33  ;;  %v1195_v36 = vadd.f32 %v1804_v17, %v872_v34  ;;  %v746_v37 = vpop.f32.mrb[27].mxu0  ;;  %v874_v38 = vpop.f32.mrb[27].mxu1 }
 0x149   :  { %1227 = vst [vmem:[%s2065_s3 + $0x68] sm:$0xff] %v1163_v35  ;;  %1259 = vst [vmem:[%s2065_s3 + $0x168] sm:$0xff] %v1195_v36 }
 0x14c   :  { %v749_v39 = vpop.f32.mrb[28].mxu0  ;;  %v877_v40 = vpop.f32.mrb[28].mxu1 }
 0x14d   :  { %v1164_v41 = vadd.f32 %v1804_v17, %v749_v39  ;;  %v1196_v42 = vadd.f32 %v1804_v17, %v877_v40  ;;  %v751_v43 = vpop.f32.mrb[29].mxu0  ;;  %v879_v44 = vpop.f32.mrb[29].mxu1 }
 0x14e   :  { %v752_v45 = vpop.f32.mrb[30].mxu0  ;;  %v880_v46 = vpop.f32.mrb[30].mxu1 }
 0x14f   :  { %1228 = vst [vmem:[%s2065_s3 + $0x70] sm:$0xff] %v1164_v41  ;;  %1260 = vst [vmem:[%s2065_s3 + $0x170] sm:$0xff] %v1196_v42  ;;  %v1165_v47 = vadd.f32 %v1804_v17, %v752_v45  ;;  %v1197_v48 = vadd.f32 %v1804_v17, %v880_v46  ;;  %v754_v49 = vpop.f32.mrb[31].mxu0  ;;  %v882_v50 = vpop.f32.mrb[31].mxu1 }
 0x151   :  { %1229 = vst [vmem:[%s2065_s3 + $0x78] sm:$0xff] %v1165_v47  ;;  %1261 = vst [vmem:[%s2065_s3 + $0x178] sm:$0xff] %v1197_v48 }
 0x154   :  { %v757_v51 = vpop.f32.mrb[32].mxu0  ;;  %v885_v52 = vpop.f32.mrb[32].mxu1 }
 0x155   :  { %v1166_v53 = vadd.f32 %v1804_v17, %v757_v51  ;;  %v1198_v54 = vadd.f32 %v1804_v17, %v885_v52  ;;  %v759_v55 = vpop.f32.mrb[33].mxu0  ;;  %v887_v56 = vpop.f32.mrb[33].mxu1 }
 0x156   :  { %v760_v57 = vpop.f32.mrb[34].mxu0  ;;  %v888_v58 = vpop.f32.mrb[34].mxu1 }
 0x157   :  { %1230 = vst [vmem:[%s2065_s3 + $0x80] sm:$0xff] %v1166_v53  ;;  %1262 = vst [vmem:[%s2065_s3 + $0x180] sm:$0xff] %v1198_v54  ;;  %v1167_v59 = vadd.f32 %v1804_v17, %v760_v57  ;;  %v1199_v60 = vadd.f32 %v1804_v17, %v888_v58  ;;  %v762_v61 = vpop.f32.mrb[35].mxu0  ;;  %v890_v62 = vpop.f32.mrb[35].mxu1 }
 0x159   :  { %1231 = vst [vmem:[%s2065_s3 + $0x88] sm:$0xff] %v1167_v59  ;;  %1263 = vst [vmem:[%s2065_s3 + $0x188] sm:$0xff] %v1199_v60 }
 0x15c   :  { %v765_v63 = vpop.f32.mrb[36].mxu0  ;;  %v893_v0 = vpop.f32.mrb[36].mxu1 }
 0x15d   :  { %v1168_v1 = vadd.f32 %v1804_v17, %v765_v63  ;;  %v1200_v2 = vadd.f32 %v1804_v17, %v893_v0  ;;  %v767_v3 = vpop.f32.mrb[37].mxu0  ;;  %v895_v4 = vpop.f32.mrb[37].mxu1 }
 0x15e   :  { %v768_v5 = vpop.f32.mrb[38].mxu0  ;;  %v896_v6 = vpop.f32.mrb[38].mxu1 }
 0x15f   :  { %1232 = vst [vmem:[%s2065_s3 + $0x90] sm:$0xff] %v1168_v1  ;;  %1264 = vst [vmem:[%s2065_s3 + $0x190] sm:$0xff] %v1200_v2  ;;  %v1169_v7 = vadd.f32 %v1804_v17, %v768_v5  ;;  %v1201_v8 = vadd.f32 %v1804_v17, %v896_v6  ;;  %v770_v9 = vpop.f32.mrb[39].mxu0  ;;  %v898_v10 = vpop.f32.mrb[39].mxu1 }
 0x161   :  { %1233 = vst [vmem:[%s2065_s3 + $0x98] sm:$0xff] %v1169_v7  ;;  %1265 = vst [vmem:[%s2065_s3 + $0x198] sm:$0xff] %v1201_v8 }
 0x164   :  { %v773_v11 = vpop.f32.mrb[40].mxu0  ;;  %v901_v12 = vpop.f32.mrb[40].mxu1 }
 0x165   :  { %v1170_v13 = vadd.f32 %v1804_v17, %v773_v11  ;;  %v1202_v14 = vadd.f32 %v1804_v17, %v901_v12  ;;  %v775_v15 = vpop.f32.mrb[41].mxu0  ;;  %v903_v16 = vpop.f32.mrb[41].mxu1 }
 0x166   :  { %v776_v18 = vpop.f32.mrb[42].mxu0  ;;  %v904_v19 = vpop.f32.mrb[42].mxu1 }
 0x167   :  { %1234 = vst [vmem:[%s2065_s3 + $0xa0] sm:$0xff] %v1170_v13  ;;  %1266 = vst [vmem:[%s2065_s3 + $0x1a0] sm:$0xff] %v1202_v14  ;;  %v1171_v20 = vadd.f32 %v1804_v17, %v776_v18  ;;  %v1203_v21 = vadd.f32 %v1804_v17, %v904_v19  ;;  %v778_v22 = vpop.f32.mrb[43].mxu0  ;;  %v906_v23 = vpop.f32.mrb[43].mxu1 }
 0x169   :  { %1235 = vst [vmem:[%s2065_s3 + $0xa8] sm:$0xff] %v1171_v20  ;;  %1267 = vst [vmem:[%s2065_s3 + $0x1a8] sm:$0xff] %v1203_v21 }
 0x16c   :  { %v781_v24 = vpop.f32.mrb[44].mxu0  ;;  %v909_v25 = vpop.f32.mrb[44].mxu1 }
 0x16d   :  { %v1172_v26 = vadd.f32 %v1804_v17, %v781_v24  ;;  %v1204_v27 = vadd.f32 %v1804_v17, %v909_v25  ;;  %v783_v28 = vpop.f32.mrb[45].mxu0  ;;  %v911_v29 = vpop.f32.mrb[45].mxu1 }
 0x16e   :  { %v784_v30 = vpop.f32.mrb[46].mxu0  ;;  %v912_v31 = vpop.f32.mrb[46].mxu1 }
 0x16f   :  { %1236 = vst [vmem:[%s2065_s3 + $0xb0] sm:$0xff] %v1172_v26  ;;  %1268 = vst [vmem:[%s2065_s3 + $0x1b0] sm:$0xff] %v1204_v27  ;;  %v1173_v32 = vadd.f32 %v1804_v17, %v784_v30  ;;  %v1205_v33 = vadd.f32 %v1804_v17, %v912_v31  ;;  %v786_v34 = vpop.f32.mrb[47].mxu0  ;;  %v914_v35 = vpop.f32.mrb[47].mxu1 }
 0x171   :  { %1237 = vst [vmem:[%s2065_s3 + $0xb8] sm:$0xff] %v1173_v32  ;;  %1269 = vst [vmem:[%s2065_s3 + $0x1b8] sm:$0xff] %v1205_v33 }
 0x174   :  { %v789_v36 = vpop.f32.mrb[48].mxu0  ;;  %v917_v37 = vpop.f32.mrb[48].mxu1 }
 0x175   :  { %v1174_v38 = vadd.f32 %v1804_v17, %v789_v36  ;;  %v1206_v39 = vadd.f32 %v1804_v17, %v917_v37  ;;  %v791_v40 = vpop.f32.mrb[49].mxu0  ;;  %v919_v41 = vpop.f32.mrb[49].mxu1 }
 0x176   :  { %v792_v42 = vpop.f32.mrb[50].mxu0  ;;  %v920_v43 = vpop.f32.mrb[50].mxu1 }
 0x177   :  { %1238 = vst [vmem:[%s2065_s3 + $0xc0] sm:$0xff] %v1174_v38  ;;  %1270 = vst [vmem:[%s2065_s3 + $0x1c0] sm:$0xff] %v1206_v39  ;;  %v1175_v44 = vadd.f32 %v1804_v17, %v792_v42  ;;  %v1207_v45 = vadd.f32 %v1804_v17, %v920_v43  ;;  %v794_v46 = vpop.f32.mrb[51].mxu0  ;;  %v922_v47 = vpop.f32.mrb[51].mxu1 }
 0x179   :  { %1239 = vst [vmem:[%s2065_s3 + $0xc8] sm:$0xff] %v1175_v44  ;;  %1271 = vst [vmem:[%s2065_s3 + $0x1c8] sm:$0xff] %v1207_v45 }
 0x17c   :  { %v797_v48 = vpop.f32.mrb[52].mxu0  ;;  %v925_v49 = vpop.f32.mrb[52].mxu1 }
 0x17d   :  { %v1176_v50 = vadd.f32 %v1804_v17, %v797_v48  ;;  %v1208_v51 = vadd.f32 %v1804_v17, %v925_v49  ;;  %v799_v52 = vpop.f32.mrb[53].mxu0  ;;  %v927_v53 = vpop.f32.mrb[53].mxu1 }
 0x17e   :  { %v800_v54 = vpop.f32.mrb[54].mxu0  ;;  %v928_v55 = vpop.f32.mrb[54].mxu1 }
 0x17f   :  { %1240 = vst [vmem:[%s2065_s3 + $0xd0] sm:$0xff] %v1176_v50  ;;  %1272 = vst [vmem:[%s2065_s3 + $0x1d0] sm:$0xff] %v1208_v51  ;;  %v1177_v56 = vadd.f32 %v1804_v17, %v800_v54  ;;  %v1209_v57 = vadd.f32 %v1804_v17, %v928_v55  ;;  %v802_v58 = vpop.f32.mrb[55].mxu0  ;;  %v930_v59 = vpop.f32.mrb[55].mxu1 }
 0x181   :  { %1241 = vst [vmem:[%s2065_s3 + $0xd8] sm:$0xff] %v1177_v56  ;;  %1273 = vst [vmem:[%s2065_s3 + $0x1d8] sm:$0xff] %v1209_v57 }
 0x184   :  { %v805_v60 = vpop.f32.mrb[56].mxu0  ;;  %v933_v61 = vpop.f32.mrb[56].mxu1 }
 0x185   :  { %v1178_v62 = vadd.f32 %v1804_v17, %v805_v60  ;;  %v1210_v63 = vadd.f32 %v1804_v17, %v933_v61  ;;  %v807_v0 = vpop.f32.mrb[57].mxu0  ;;  %v935_v1 = vpop.f32.mrb[57].mxu1 }
 0x186   :  { %v808_v2 = vpop.f32.mrb[58].mxu0  ;;  %v936_v3 = vpop.f32.mrb[58].mxu1 }
 0x187   :  { %1242 = vst [vmem:[%s2065_s3 + $0xe0] sm:$0xff] %v1178_v62  ;;  %1274 = vst [vmem:[%s2065_s3 + $0x1e0] sm:$0xff] %v1210_v63  ;;  %v1179_v4 = vadd.f32 %v1804_v17, %v808_v2  ;;  %v1211_v5 = vadd.f32 %v1804_v17, %v936_v3  ;;  %v810_v6 = vpop.f32.mrb[59].mxu0  ;;  %v938_v7 = vpop.f32.mrb[59].mxu1 }
 0x189   :  { %1243 = vst [vmem:[%s2065_s3 + $0xe8] sm:$0xff] %v1179_v4  ;;  %1275 = vst [vmem:[%s2065_s3 + $0x1e8] sm:$0xff] %v1211_v5 }
 0x18c   :  { %v813_v8 = vpop.f32.mrb[60].mxu0  ;;  %v941_v9 = vpop.f32.mrb[60].mxu1 }
 0x18d   :  { %v1180_v10 = vadd.f32 %v1804_v17, %v813_v8  ;;  %v1212_v11 = vadd.f32 %v1804_v17, %v941_v9  ;;  %v815_v12 = vpop.f32.mrb[61].mxu0  ;;  %v943_v13 = vpop.f32.mrb[61].mxu1 }
 0x18e   :  { %v816_v14 = vpop.f32.mrb[62].mxu0  ;;  %v944_v15 = vpop.f32.mrb[62].mxu1 }
 0x18f   :  { %1244 = vst [vmem:[%s2065_s3 + $0xf0] sm:$0xff] %v1180_v10  ;;  %1276 = vst [vmem:[%s2065_s3 + $0x1f0] sm:$0xff] %v1212_v11  ;;  %v1181_v16 = vadd.f32 %v1804_v17, %v816_v14  ;;  %v1213_v18 = vadd.f32 %v1804_v17, %v944_v15  ;;  %v818_v19 = vpop.f32.mrb[63].mxu0  ;;  %v946_v20 = vpop.f32.mrb[63].mxu1 }
 0x191   :  { %1245 = vst [vmem:[%s2065_s3 + $0xf8] sm:$0xff] %v1181_v16  ;;  %1277 = vst [vmem:[%s2065_s3 + $0x1f8] sm:$0xff] %v1213_v18 }

// kernel: discriminator_forward.6
= control target key start
LH: loop header
LB: loop body
LE: loop exit
PB: predicated region body
PF: predicated region fallthrough
CT: control target
= control target key end

     0   :  { %s652_s1 = inlined_call_operand.vmem [shape: bf16[128,128], index: 1, kind: input, shape index: {}]   ;;  %s653_s0 = inlined_call_operand.vmem [shape: bf16[128,128], index: 0, kind: input, shape index: {}]   ;;  %s654_s2 = inlined_call_operand.vmem [shape: f32[1,128], index: 2, kind: input, shape index: {}]   ;;  %s655_s3 = inlined_call_operand.vmem [shape: f32[128,128], index: 3, kind: output, shape index: {}]  }
   0x1   :  { %v499_v0 = vld [vmem:[%s652_s1] sm:$0xff]   ;;  %v500_v1 = vld [vmem:[%s652_s1 + $0x8] sm:$0xff]   ;;  %v501_v2 = vld [vmem:[%s652_s1 + $0x10] sm:$0xff]  }
   0x2   :  { %451 = vmatprep.subr.bf16.mxu0 %v499_v0  ;;  %483 = vmatprep.subr.bf16.mxu1 %v499_v0  ;;  %v502_v3 = vld [vmem:[%s652_s1 + $0x18] sm:$0xff]   ;;  %v507_v4 = vld [vmem:[%s653_s0] sm:$0xff]   ;;  %v504_v7 = vld [vmem:[%s652_s1 + $0x28] sm:$0xff]  }
   0x3   :  { %452 = vmatpush3.bf16.msra.mxu0 %v499_v0  ;;  %491 = vmatpush3.bf16.msra.mxu1 %v499_v0  ;;  %v508_v5 = vld [vmem:[%s653_s0 + $0x20] sm:$0xff]   ;;  %v505_v8 = vld [vmem:[%s652_s1 + $0x30] sm:$0xff]   ;;  %v506_v9 = vld [vmem:[%s652_s1 + $0x38] sm:$0xff]  }
   0x4   :  { %453 = vmatprep.subr.bf16.mxu0 %v500_v1  ;;  %484 = vmatprep.subr.bf16.mxu1 %v500_v1  ;;  %v503_v6 = vld [vmem:[%s652_s1 + $0x20] sm:$0xff]   ;;  %v509_v10 = vld [vmem:[%s653_s0 + $0x8] sm:$0xff]   ;;  %v511_v12 = vld [vmem:[%s653_s0 + $0x10] sm:$0xff]  }
   0x5   :  { %467 = vmatprep.mubr.bf16.mxu0 %v507_v4  ;;  %475 = vmatprep.mubr.bf16.mxu1 %v508_v5  ;;  %v510_v11 = vld [vmem:[%s653_s0 + $0x28] sm:$0xff]   ;;  %v512_v13 = vld [vmem:[%s653_s0 + $0x30] sm:$0xff]   ;;  %v513_v14 = vld [vmem:[%s653_s0 + $0x18] sm:$0xff]  }
   0x6   :  { %v514_v15 = vld [vmem:[%s653_s0 + $0x38] sm:$0xff]   ;;  %v586_v16 = vld [vmem:[%s654_s2] ss:$0 sm:$0xff] }
   0x7   :  { %454 = vmatpush3.bf16.msra.mxu0 %v500_v1  ;;  %492 = vmatpush3.bf16.msra.mxu1 %v500_v1 }
   0x8   :  { %455 = vmatprep.subr.bf16.mxu0 %v501_v2  ;;  %485 = vmatprep.subr.bf16.mxu1 %v501_v2 }
   0xb   :  { %456 = vmatpush3.bf16.msra.mxu0 %v501_v2  ;;  %493 = vmatpush3.bf16.msra.mxu1 %v501_v2 }
   0xc   :  { %457 = vmatprep.subr.bf16.mxu0 %v502_v3  ;;  %486 = vmatprep.subr.bf16.mxu1 %v502_v3 }
   0xf   :  { %458 = vmatpush3.bf16.msra.mxu0 %v502_v3  ;;  %494 = vmatpush3.bf16.msra.mxu1 %v502_v3 }
  0x10   :  { %459 = vmatprep.subr.bf16.mxu0 %v503_v6  ;;  %487 = vmatprep.subr.bf16.mxu1 %v503_v6 }
  0x13   :  { %460 = vmatpush3.bf16.msra.mxu0 %v503_v6  ;;  %495 = vmatpush3.bf16.msra.mxu1 %v503_v6 }
  0x14   :  { %461 = vmatprep.subr.bf16.mxu0 %v504_v7  ;;  %488 = vmatprep.subr.bf16.mxu1 %v504_v7 }
  0x17   :  { %462 = vmatpush3.bf16.msra.mxu0 %v504_v7  ;;  %496 = vmatpush3.bf16.msra.mxu1 %v504_v7 }
  0x18   :  { %463 = vmatprep.subr.bf16.mxu0 %v505_v8  ;;  %489 = vmatprep.subr.bf16.mxu1 %v505_v8 }
  0x1b   :  { %464 = vmatpush3.bf16.msra.mxu0 %v505_v8  ;;  %497 = vmatpush3.bf16.msra.mxu1 %v505_v8 }
  0x1c   :  { %465 = vmatprep.subr.bf16.mxu0 %v506_v9  ;;  %490 = vmatprep.subr.bf16.mxu1 %v506_v9 }
  0x1f   :  { %466 = vmatpush3.bf16.msra.mxu0 %v506_v9  ;;  %498 = vmatpush3.bf16.msra.mxu1 %v506_v9 }
  0x22   :  { %468 = vmatmul.mubr.bf16.vlgmr.msra.gmra.mrb[0].mxu0 %v509_v10  ;;  %476 = vmatmul.mubr.bf16.vlgmr.msra.gmra.mrb[0].mxu1 %v510_v11 }
  0x23   :  { %471 = vmatprep.mubr.bf16.mxu0 %v511_v12  ;;  %479 = vmatprep.mubr.bf16.mxu1 %v512_v13 }
  0x2a   :  { %472 = vmatmul.mubr.bf16.gmra.mrb[4].mxu0 %v513_v14  ;;  %480 = vmatmul.mubr.bf16.gmra.mrb[4].mxu1 %v514_v15 }
  0xf5   :  { %v469_v17 = vpop.f32.mrb[0].mxu0  ;;  %v477_v18 = vpop.f32.mrb[0].mxu1 }
  0xf6   :  { %v336_v19 = vadd.f32 %v469_v17, %v586_v16  ;;  %v344_v20 = vadd.f32 %v477_v18, %v586_v16  ;;  %v213_v21 = vpop.f32.mrb[1].mxu0  ;;  %v245_v22 = vpop.f32.mrb[1].mxu1 }
  0xf7   :  { %v334_v23 = vadd.f32 %v586_v16, %v213_v21  ;;  %v342_v24 = vadd.f32 %v586_v16, %v245_v22  ;;  %v470_v25 = vpop.f32.mrb[2].mxu0  ;;  %v478_v26 = vpop.f32.mrb[2].mxu1 }
  0xf8   :  { %vm352_vm0 = vcmp.ge.f32.partialorder %v336_v19, 0.0  ;;  %v368_v27 = vmul.f32 0.2, %v336_v19  ;;  %vm360_vm1 = vcmp.ge.f32.partialorder %v344_v20, 0.0  ;;  %v376_v28 = vmul.f32 0.2, %v344_v20 }
  0xf9   :  { %vm350_vm2 = vcmp.ge.f32.partialorder %v334_v23, 0.0  ;;  %v366_v29 = vmul.f32 0.2, %v334_v23  ;;  %vm358_vm3 = vcmp.ge.f32.partialorder %v342_v24, 0.0  ;;  %v374_v30 = vmul.f32 0.2, %v342_v24 }
  0xfa   :  { %v384_v31 = vsel %vm352_vm0, %v336_v19, %v368_v27  ;;  %v392_v32 = vsel %vm360_vm1, %v344_v20, %v376_v28  ;;  %v337_v33 = vadd.f32 %v470_v25, %v586_v16  ;;  %v345_v34 = vadd.f32 %v478_v26, %v586_v16  ;;  %v216_v35 = vpop.f32.mrb[3].mxu0  ;;  %v248_v36 = vpop.f32.mrb[3].mxu1 }
  0xfb   :  { %400 = vst [vmem:[%s655_s3 + $0x10] sm:$0xff] %v384_v31  ;;  %408 = vst [vmem:[%s655_s3 + $0x50] sm:$0xff] %v392_v32  ;;  %v382_v37 = vsel %vm350_vm2, %v334_v23, %v366_v29  ;;  %v390_v38 = vsel %vm358_vm3, %v342_v24, %v374_v30  ;;  %v335_v39 = vadd.f32 %v586_v16, %v216_v35 }
  0xfc   :  { %v343_v40 = vadd.f32 %v586_v16, %v248_v36  ;;  %398 = vst [vmem:[%s655_s3] sm:$0xff] %v382_v37  ;;  %406 = vst [vmem:[%s655_s3 + $0x40] sm:$0xff] %v390_v38  ;;  %vm353_vm4 = vcmp.ge.f32.partialorder %v337_v33, 0.0  ;;  %v369_v41 = vmul.f32 0.2, %v337_v33  ;;  %vm361_vm5 = vcmp.ge.f32.partialorder %v345_v34, 0.0 }
  0xfd   :  { %v377_v42 = vmul.f32 0.2, %v345_v34  ;;  %vm351_vm6 = vcmp.ge.f32.partialorder %v335_v39, 0.0  ;;  %v367_v43 = vmul.f32 0.2, %v335_v39  ;;  %v473_v47 = vpop.f32.mrb[4].mxu0 }
  0xfe   :  { %vm359_vm7 = vcmp.ge.f32.partialorder %v343_v40, 0.0  ;;  %v375_v44 = vmul.f32 0.2, %v343_v40  ;;  %v385_v45 = vsel %vm353_vm4, %v337_v33, %v369_v41  ;;  %v481_v48 = vpop.f32.mrb[4].mxu1  ;;  %v340_v51 = vadd.f32 %v473_v47, %v586_v16  ;;  %v229_v53 = vpop.f32.mrb[5].mxu0 }
  0xff   :  { %v393_v46 = vsel %vm361_vm5, %v345_v34, %v377_v42  ;;  %401 = vst [vmem:[%s655_s3 + $0x18] sm:$0xff] %v385_v45  ;;  %v383_v49 = vsel %vm351_vm6, %v335_v39, %v367_v43  ;;  %v348_v52 = vadd.f32 %v481_v48, %v586_v16  ;;  %v261_v54 = vpop.f32.mrb[5].mxu1  ;;  %v338_v55 = vadd.f32 %v586_v16, %v229_v53  ;;  %v474_v57 = vpop.f32.mrb[6].mxu0 }
 0x100   :  { %409 = vst [vmem:[%s655_s3 + $0x58] sm:$0xff] %v393_v46  ;;  %v391_v50 = vsel %vm359_vm7, %v343_v40, %v375_v44  ;;  %399 = vst [vmem:[%s655_s3 + $0x8] sm:$0xff] %v383_v49  ;;  %v346_v56 = vadd.f32 %v586_v16, %v261_v54  ;;  %v482_v58 = vpop.f32.mrb[6].mxu1  ;;  %vm356_vm8 = vcmp.ge.f32.partialorder %v340_v51, 0.0  ;;  %v372_v59 = vmul.f32 0.2, %v340_v51 }
 0x101   :  { %407 = vst [vmem:[%s655_s3 + $0x48] sm:$0xff] %v391_v50  ;;  %vm364_vm9 = vcmp.ge.f32.partialorder %v348_v52, 0.0  ;;  %v380_v60 = vmul.f32 0.2, %v348_v52  ;;  %vm354_vm10 = vcmp.ge.f32.partialorder %v338_v55, 0.0  ;;  %v341_v1 = vadd.f32 %v474_v57, %v586_v16  ;;  %v232_v3 = vpop.f32.mrb[7].mxu0 }
 0x102   :  { %v370_v61 = vmul.f32 0.2, %v338_v55  ;;  %vm362_vm11 = vcmp.ge.f32.partialorder %v346_v56, 0.0  ;;  %v378_v62 = vmul.f32 0.2, %v346_v56  ;;  %v388_v63 = vsel %vm356_vm8, %v340_v51, %v372_v59  ;;  %v264_v4 = vpop.f32.mrb[7].mxu1 }
 0x103   :  { %v396_v0 = vsel %vm364_vm9, %v348_v52, %v380_v60  ;;  %v349_v2 = vadd.f32 %v482_v58, %v586_v16  ;;  %404 = vst [vmem:[%s655_s3 + $0x30] sm:$0xff] %v388_v63  ;;  %v339_v7 = vadd.f32 %v586_v16, %v232_v3  ;;  %v347_v8 = vadd.f32 %v586_v16, %v264_v4 }
 0x104   :  { %412 = vst [vmem:[%s655_s3 + $0x70] sm:$0xff] %v396_v0  ;;  %v386_v5 = vsel %vm354_vm10, %v338_v55, %v370_v61  ;;  %v394_v6 = vsel %vm362_vm11, %v346_v56, %v378_v62  ;;  %vm357_vm12 = vcmp.ge.f32.partialorder %v341_v1, 0.0  ;;  %v373_v9 = vmul.f32 0.2, %v341_v1 }
 0x105   :  { %402 = vst [vmem:[%s655_s3 + $0x20] sm:$0xff] %v386_v5  ;;  %410 = vst [vmem:[%s655_s3 + $0x60] sm:$0xff] %v394_v6  ;;  %vm365_vm13 = vcmp.ge.f32.partialorder %v349_v2, 0.0  ;;  %v381_v10 = vmul.f32 0.2, %v349_v2  ;;  %vm355_vm14 = vcmp.ge.f32.partialorder %v339_v7, 0.0 }
 0x106   :  { %v371_v11 = vmul.f32 0.2, %v339_v7  ;;  %vm363_vm15 = vcmp.ge.f32.partialorder %v347_v8, 0.0  ;;  %v379_v12 = vmul.f32 0.2, %v347_v8  ;;  %v389_v13 = vsel %vm357_vm12, %v341_v1, %v373_v9 }
 0x107   :  { %v397_v14 = vsel %vm365_vm13, %v349_v2, %v381_v10  ;;  %405 = vst [vmem:[%s655_s3 + $0x38] sm:$0xff] %v389_v13 }
 0x108   :  { %413 = vst [vmem:[%s655_s3 + $0x78] sm:$0xff] %v397_v14  ;;  %v387_v15 = vsel %vm355_vm14, %v339_v7, %v371_v11  ;;  %v395_v16 = vsel %vm363_vm15, %v347_v8, %v379_v12 }
 0x109   :  { %403 = vst [vmem:[%s655_s3 + $0x28] sm:$0xff] %v387_v15  ;;  %411 = vst [vmem:[%s655_s3 + $0x68] sm:$0xff] %v395_v16 }

// kernel: discriminator_forward.7
= control target key start
LH: loop header
LB: loop body
LE: loop exit
PB: predicated region body
PF: predicated region fallthrough
CT: control target
= control target key end

     0   :  { %s767_s12 = smov 0   ;;  %s769_s13 = smov 0   ;;  %s858_s0 = inlined_call_operand.vmem [shape: bf16[32,256], index: 0, kind: input, shape index: {}]   ;;  %s859_s1 = inlined_call_operand.vmem [shape: bf16[256,128], index: 1, kind: input, shape index: {}]   ;;  %s860_s2 = inlined_call_operand.vmem [shape: f32[1,128], index: 2, kind: input, shape index: {}]   ;;  %s861_s3 = inlined_call_operand.vmem [shape: f32[32,128], index: 3, kind: output, shape index: {}]  }
   0x1   :  { %s771_s14 = smov 0  }
   0x2 LB: > { %s32_s15 = sadd.s32 1, %s741_s13  ;;  %p628_p0 = scmp.ge.s32.totalorder %s745_s14, 1  ;;  %s745_s14 = sphi %s771_s14, %s13_s14   ;;  %s741_s13 = sphi %s769_s13, %s863_s13   ;;  %s737_s12 = sphi %s767_s12, %s862_s12  }
   0x3   : > { %p34_p1 = scmp.ge.s32.totalorder %s32_s15, 2  ;;  %p191_p2 = scmp.lt.s32.totalorder %s745_s14, 3 }
   0x5   : > { %s865_s15 = smov (%p34_p1, %s32_s15), 0  ;;  %p192_p3 = pnand %p628_p0, %p191_p2 }
   0x6   : > { %v702_v0 = vld [vmem:[%s859_s1 + $0x40] sm:$0xff] (!%p192_p3)   ;;  %s629_s18 = sshll.u32 (!%p192_p3), %s737_s12, 1  ;;  %v704_v2 = vld [vmem:[%s859_s1 + $0x48] sm:$0xff] (!%p192_p3)   ;;  %v706_v4 = vld [vmem:[%s859_s1 + $0x50] sm:$0xff] (!%p192_p3)  }
   0x7   : > { %195 = sbr.rel (%p192_p3) target bundleno = 313 (0x139), region = 32  ;;  %v703_v1 = vld [vmem:[%s859_s1] sm:$0xff] (!%p192_p3)   ;;  %656 = vmatprep.subr.bf16.mxu0 (!%p192_p3), %v702_v0  ;;  %v705_v3 = vld [vmem:[%s859_s1 + $0x8] sm:$0xff] (!%p192_p3)   ;;  %p236_p4 = scmp.lt.s32.totalorder (!%p192_p3), %s629_s18, 3  ;;  %v707_v5 = vld [vmem:[%s859_s1 + $0x10] sm:$0xff] (!%p192_p3)  }
   0x8   : > { %657 = vmatpush3.bf16.msra.mxu0 (!%p192_p3), %v703_v1  ;;  %v708_v6 = vld [vmem:[%s859_s1 + $0x58] sm:$0xff] (!%p192_p3)   ;;  %v710_v8 = vld [vmem:[%s859_s1 + $0x60] sm:$0xff] (!%p192_p3)   ;;  %v712_v10 = vld [vmem:[%s859_s1 + $0x68] sm:$0xff] (!%p192_p3)  }
   0x9   : > { %658 = vmatprep.subr.bf16.mxu0 (!%p192_p3), %v704_v2  ;;  %v709_v7 = vld [vmem:[%s859_s1 + $0x18] sm:$0xff] (!%p192_p3)   ;;  %v711_v9 = vld [vmem:[%s859_s1 + $0x20] sm:$0xff] (!%p192_p3)   ;;  %v713_v12 = vld [vmem:[%s859_s1 + $0x28] sm:$0xff] (!%p192_p3)  }
   0xa   : > { %v714_v13 = vld [vmem:[%s859_s1 + $0x70] sm:$0xff] (!%p192_p3)   ;;  %v716_v15 = vld [vmem:[%s859_s1 + $0x78] sm:$0xff] (!%p192_p3)   ;;  %v652_v22 = vld [vmem:[%s860_s2] ss:$0 sm:$0xff] (!%p192_p3) }
   0xb   : > { %v715_v14 = vld [vmem:[%s859_s1 + $0x30] sm:$0xff] (!%p192_p3)   ;;  %v717_v16 = vld [vmem:[%s859_s1 + $0x38] sm:$0xff] (!%p192_p3)  }
   0xc   : > { %659 = vmatpush3.bf16.msra.mxu0 (!%p192_p3), %v705_v3 }
   0xd   : > { %660 = vmatprep.subr.bf16.mxu0 (!%p192_p3), %v706_v4 }
   0xe   : > { %s867_s18 = smov (!%p236_p4, %s629_s18), 3 }
   0xf   : > { %s655_s6 = sshll.u32 %s867_s18, 3 }
  0x10   : > { %661 = vmatpush3.bf16.msra.mxu0 %v707_v5  ;;  %s243_s11 = scalar_lea.vmem %s858_s0, %s655_s6  ;;  %s265_s8 = scalar_lea.vmem %s861_s3, %s655_s6 }
  0x11   : > { %662 = vmatprep.subr.bf16.mxu0 %v708_v6  ;;  %v720_v11 = vld [vmem:[%s243_s11 + $0x4] ss:$8 sps:$4 sm:$0xff]   ;;  %v718_v17 = vld [vmem:[%s243_s11] ss:$8 sps:$4 sm:$0xff]  }
  0x12   : > { %448 = vmatprep.mubr.bf16.mxu0 %v720_v11 }
  0x14   : > { %663 = vmatpush3.bf16.msra.mxu0 %v709_v7 }
  0x15   : > { %664 = vmatprep.subr.bf16.mxu0 %v710_v8 }
  0x18   : > { %665 = vmatpush3.bf16.msra.mxu0 %v711_v9 }
  0x19   : > { %666 = vmatprep.subr.bf16.mxu0 %v712_v10 }
  0x1c   : > { %667 = vmatpush3.bf16.msra.mxu0 %v713_v12 }
  0x1d   : > { %668 = vmatprep.subr.bf16.mxu0 %v714_v13 }
  0x20   : > { %669 = vmatpush3.bf16.msra.mxu0 %v715_v14 }
  0x21   : > { %670 = vmatprep.subr.bf16.mxu0 %v716_v15 }
  0x24   : > { %671 = vmatpush3.bf16.msra.mxu0 %v717_v16 }
  0x27   : > { %449 = vmatmul.mubr.bf16.vlgmr.msra.gmra.mrb[0].mxu0 %v718_v17 }
  0xfa   : > { %v672_v18 = vpop.f32.mrb[0].mxu0 }
  0xfb   : > { %v673_v19 = vpop.f32.mrb[1].mxu0 }
  0xfc   : > { %v674_v20 = vadd.f32 %v673_v19, %v672_v18  ;;  %v675_v21 = vpop.f32.mrb[2].mxu0 }
  0xfd   : > { %v676_v23 = vpop.f32.mrb[3].mxu0 }
  0xfe   : > { %v677_v24 = vadd.f32 %v676_v23, %v675_v21  ;;  %v473_v25 = vadd.f32 %v674_v20, %v652_v22 }
 0x100   : > { %v474_v26 = vadd.f32 %v677_v24, %v652_v22 }
 0x102   : > { %v475_v27 = vadd.f32 %v474_v26, %v473_v25 }
 0x104   : > { %v476_v28 = vrot.slane %v475_v27, 4 }
 0x106   : > { %v477_v29 = vadd.f32 %v476_v28, %v475_v27 }
 0x108   : > { %v478_v30 = vrot.slane %v477_v29, 2 }
 0x10a   : > { %v479_v31 = vadd.f32 %v478_v30, %v477_v29 }
 0x10c   : > { %v480_v32 = vrot.slane %v479_v31, 1 }
 0x10e   : > { %v481_v33 = vadd.f32 %v480_v32, %v479_v31 }
 0x110   : > { %v483_v34 = vmul.f32 0.0625, %v481_v33 }
 0x112   : > { %v484_v35 = vsub.f32 %v473_v25, %v483_v34  ;;  %v485_v36 = vsub.f32 %v474_v26, %v483_v34 }
 0x114   : > { %v486_v37 = vmul.f32 %v484_v35, %v484_v35  ;;  %v487_v38 = vmul.f32 %v485_v36, %v485_v36 }
 0x116   : > { %v488_v39 = vadd.f32 %v487_v38, %v486_v37 }
 0x118   : > { %v489_v40 = vrot.slane %v488_v39, 4 }
 0x11a   : > { %v490_v41 = vadd.f32 %v489_v40, %v488_v39 }
 0x11c   : > { %v491_v42 = vrot.slane %v490_v41, 2 }
 0x11e   : > { %v492_v43 = vadd.f32 %v491_v42, %v490_v41 }
 0x120   : > { %v493_v44 = vrot.slane %v492_v43, 1 }
 0x122   : > { %v494_v45 = vadd.f32 %v493_v44, %v492_v43 }
 0x124   : > { %v495_v46 = vmul.f32 0.0625, %v494_v45 }
 0x126   : > { %v496_v47 = vadd.f32 1e-05, %v495_v46 }
 0x128   : > { %721 = vrsqrt.f32 %v496_v47 }
 0x132   : > { %v722_v48 = vpop.eup %721 }
 0x133   : > { %v498_v49 = vmul.f32 %v722_v48, %v484_v35  ;;  %v499_v50 = vmul.f32 %v722_v48, %v485_v36 }
 0x135   : > { %vm500_vm0 = vcmp.ge.f32.partialorder %v498_v49, 0.0  ;;  %vm501_vm1 = vcmp.ge.f32.partialorder %v499_v50, 0.0  ;;  %v502_v51 = vmul.f32 0.2, %v498_v49  ;;  %v503_v52 = vmul.f32 0.2, %v499_v50 }
 0x137   : > { %v504_v53 = vsel %vm500_vm0, %v498_v49, %v502_v51  ;;  %v505_v54 = vsel %vm501_vm1, %v499_v50, %v503_v52 }
 0x138   : > { %506 = vst [vmem:[%s265_s8] sm:$0xff] %v504_v53  ;;  %507 = vst [vmem:[%s265_s8 + $0x8] sm:$0xff] %v505_v54 }
 0x139 PF: > { %s13_s14 = sadd.s32 1, %s745_s14   ;;  %s862_s12 = smov %s741_s13 }
 0x13a   : > { %p10_p5 = scmp.ge.s32.totalorder %s13_s14, 4   ;;  %s863_s13 = smov %s865_s15 }
 0x13c   :  { %12 = sbr.rel (!%p10_p5) target bundleno = 2 (0x2), region = 76 }

// kernel: discriminator_forward.8
= control target key start
LH: loop header
LB: loop body
LE: loop exit
PB: predicated region body
PF: predicated region fallthrough
CT: control target
= control target key end

     0   :  { %s976_s12 = smov 0   ;;  %s978_s13 = smov 0   ;;  %s1116_s0 = inlined_call_operand.vmem [shape: bf16[16,512], index: 0, kind: input, shape index: {}]   ;;  %s1117_s1 = inlined_call_operand.vmem [shape: bf16[512,128], index: 1, kind: input, shape index: {}]   ;;  %s1118_s2 = inlined_call_operand.vmem [shape: f32[1,128], index: 2, kind: input, shape index: {}]   ;;  %s1119_s3 = inlined_call_operand.vmem [shape: f32[16,128], index: 3, kind: output, shape index: {}]  }
   0x1   :  { %s980_s14 = smov 0  }
   0x2 LB: > { %s32_s15 = sadd.s32 1, %s949_s13  ;;  %p779_p0 = scmp.ge.s32.totalorder %s953_s14, 1  ;;  %s953_s14 = sphi %s980_s14, %s13_s14   ;;  %s949_s13 = sphi %s978_s13, %s1121_s13   ;;  %s945_s12 = sphi %s976_s12, %s1120_s12  }
   0x3   : > { %p34_p1 = scmp.ge.s32.totalorder %s32_s15, 2  ;;  %p189_p2 = scmp.lt.s32.totalorder %s953_s14, 3 }
   0x5   : > { %s1123_s15 = smov (%p34_p1, %s32_s15), 0  ;;  %p190_p3 = pnand %p779_p0, %p189_p2 }
   0x6   : > { %v893_v0 = vld [vmem:[%s1117_s1 + $0x40] sm:$0xff] (!%p190_p3)   ;;  %v897_v4 = vld [vmem:[%s1117_s1 + $0x48] sm:$0xff] (!%p190_p3)   ;;  %v901_v8 = vld [vmem:[%s1117_s1 + $0x50] sm:$0xff] (!%p190_p3)   ;;  %p231_p4 = scmp.lt.s32.totalorder (!%p190_p3), %s945_s12, 1  ;;  %v632_v38 = vlaneseq (!%p190_p3)  ;;  %v955_v52 = vmov (!%p190_p3), 0.0  }
   0x7   : > { %193 = sbr.rel (%p190_p3) target bundleno = 315 (0x13b), region = 32  ;;  %v894_v1 = vld [vmem:[%s1117_s1 + $0xc0] sm:$0xff] (!%p190_p3)   ;;  %824 = vmatprep.subr.bf16.mxu0 (!%p190_p3), %v893_v0  ;;  %v898_v5 = vld [vmem:[%s1117_s1 + $0xc8] sm:$0xff] (!%p190_p3)   ;;  %v902_v9 = vld [vmem:[%s1117_s1 + $0xd0] sm:$0xff] (!%p190_p3)  }
   0x8   : > { %v895_v2 = vld [vmem:[%s1117_s1] sm:$0xff] (!%p190_p3)   ;;  %846 = vmatprep.subr.bf16.mxu1 (!%p190_p3), %v894_v1  ;;  %v899_v6 = vld [vmem:[%s1117_s1 + $0x8] sm:$0xff] (!%p190_p3)   ;;  %v903_v10 = vld [vmem:[%s1117_s1 + $0x10] sm:$0xff] (!%p190_p3)   ;;  %v633_v39 = vshrl.u32 (!%p190_p3), %v632_v38, 7 }
   0x9   : > { %v896_v3 = vld [vmem:[%s1117_s1 + $0x80] sm:$0xff] (!%p190_p3)   ;;  %825 = vmatpush3.bf16.msra.mxu0 (!%p190_p3), %v895_v2  ;;  %v900_v7 = vld [vmem:[%s1117_s1 + $0x88] sm:$0xff] (!%p190_p3)   ;;  %v904_v11 = vld [vmem:[%s1117_s1 + $0x90] sm:$0xff] (!%p190_p3)  }
   0xa   : > { %847 = vmatpush3.bf16.msra.mxu1 (!%p190_p3), %v896_v3  ;;  %826 = vmatprep.subr.bf16.mxu0 (!%p190_p3), %v897_v4  ;;  %v905_v12 = vld [vmem:[%s1117_s1 + $0x58] sm:$0xff] (!%p190_p3)   ;;  %v909_v16 = vld [vmem:[%s1117_s1 + $0x60] sm:$0xff] (!%p190_p3)   ;;  %v913_v20 = vld [vmem:[%s1117_s1 + $0x68] sm:$0xff] (!%p190_p3)   ;;  %vm634_vm0 = vcmp.lt.s32.totalorder (!%p190_p3), %v633_v39, 4 }
   0xb   : > { %848 = vmatprep.subr.bf16.mxu1 (!%p190_p3), %v898_v5  ;;  %v906_v13 = vld [vmem:[%s1117_s1 + $0xd8] sm:$0xff] (!%p190_p3)   ;;  %v910_v17 = vld [vmem:[%s1117_s1 + $0xe0] sm:$0xff] (!%p190_p3)   ;;  %v914_v21 = vld [vmem:[%s1117_s1 + $0xe8] sm:$0xff] (!%p190_p3)   ;;  %v820_v53 = vsel (!%p190_p3), %vm634_vm0, 1.0, %v955_v52 }
   0xc   : > { %v907_v14 = vld [vmem:[%s1117_s1 + $0x18] sm:$0xff] (!%p190_p3)   ;;  %v911_v18 = vld [vmem:[%s1117_s1 + $0x20] sm:$0xff] (!%p190_p3)   ;;  %v915_v22 = vld [vmem:[%s1117_s1 + $0x28] sm:$0xff] (!%p190_p3)  }
   0xd   : > { %827 = vmatpush3.bf16.msra.mxu0 (!%p190_p3), %v899_v6  ;;  %v908_v15 = vld [vmem:[%s1117_s1 + $0x98] sm:$0xff] (!%p190_p3)   ;;  %v912_v19 = vld [vmem:[%s1117_s1 + $0xa0] sm:$0xff] (!%p190_p3)   ;;  %v916_v23 = vld [vmem:[%s1117_s1 + $0xa8] sm:$0xff] (!%p190_p3)  }
   0xe   : > { %849 = vmatpush3.bf16.msra.mxu1 %v900_v7  ;;  %828 = vmatprep.subr.bf16.mxu0 %v901_v8  ;;  %s1125_s12 = smov (!%p231_p4, %s945_s12), 1  ;;  %v917_v24 = vld [vmem:[%s1117_s1 + $0x70] sm:$0xff]   ;;  %v921_v28 = vld [vmem:[%s1117_s1 + $0x78] sm:$0xff]   ;;  %v819_v48 = vld [vmem:[%s1118_s2] ss:$0 sm:$0xff] }
   0xf   : > { %850 = vmatprep.subr.bf16.mxu1 %v902_v9  ;;  %v918_v25 = vld [vmem:[%s1117_s1 + $0xf0] sm:$0xff]   ;;  %s823_s24 = sshll.u32 %s1125_s12, 4  ;;  %v922_v29 = vld [vmem:[%s1117_s1 + $0xf8] sm:$0xff]   ;;  %s782_s17 = sshll.u32 %s1125_s12, 3 }
  0x10   : > { %v919_v26 = vld [vmem:[%s1117_s1 + $0x30] sm:$0xff]   ;;  %s238_s6 = scalar_lea.vmem %s1116_s0, %s823_s24  ;;  %v923_v30 = vld [vmem:[%s1117_s1 + $0x38] sm:$0xff]   ;;  %s258_s20 = scalar_lea.vmem %s1119_s3, %s782_s17 }
  0x11   : > { %829 = vmatpush3.bf16.msra.mxu0 %v903_v10  ;;  %v920_v27 = vld [vmem:[%s1117_s1 + $0xb0] sm:$0xff]   ;;  %v924_v31 = vld [vmem:[%s1117_s1 + $0xb8] sm:$0xff]   ;;  %v266_v32 = vld [vmem:[%s238_s6] sm:$0xff] }
  0x12   : > { %851 = vmatpush3.bf16.msra.mxu1 %v904_v11  ;;  %830 = vmatprep.subr.bf16.mxu0 %v905_v12  ;;  %v267_v33 = vld [vmem:[%s238_s6 + $0x8] sm:$0xff]  ;;  %v783_v34 = vcombine.low %v266_v32, %v266_v32  ;;  %v784_v35 = vcombine.high %v266_v32, %v266_v32 }
  0x13   : > { %852 = vmatprep.subr.bf16.mxu1 %v906_v13  ;;  %v785_v36 = vcombine.low %v267_v33, %v267_v33  ;;  %v786_v37 = vcombine.high %v267_v33, %v267_v33 }
  0x14   : > { %570 = vmatprep.mubr.bf16.mxu0 %v784_v35 }
  0x15   : > { %831 = vmatpush3.bf16.msra.mxu0 %v907_v14  ;;  %610 = vmatprep.mubr.bf16.mxu1 %v786_v37 }
  0x16   : > { %853 = vmatpush3.bf16.msra.mxu1 %v908_v15  ;;  %832 = vmatprep.subr.bf16.mxu0 %v909_v16 }
  0x17   : > { %854 = vmatprep.subr.bf16.mxu1 %v910_v17 }
  0x19   : > { %833 = vmatpush3.bf16.msra.mxu0 %v911_v18 }
  0x1a   : > { %855 = vmatpush3.bf16.msra.mxu1 %v912_v19  ;;  %834 = vmatprep.subr.bf16.mxu0 %v913_v20 }
  0x1b   : > { %856 = vmatprep.subr.bf16.mxu1 %v914_v21 }
  0x1d   : > { %835 = vmatpush3.bf16.msra.mxu0 %v915_v22 }
  0x1e   : > { %857 = vmatpush3.bf16.msra.mxu1 %v916_v23  ;;  %836 = vmatprep.subr.bf16.mxu0 %v917_v24 }
  0x1f   : > { %858 = vmatprep.subr.bf16.mxu1 %v918_v25 }
  0x21   : > { %837 = vmatpush3.bf16.msra.mxu0 %v919_v26 }
  0x22   : > { %859 = vmatpush3.bf16.msra.mxu1 %v920_v27  ;;  %838 = vmatprep.subr.bf16.mxu0 %v921_v28 }
  0x23   : > { %860 = vmatprep.subr.bf16.mxu1 %v922_v29 }
  0x25   : > { %839 = vmatpush3.bf16.msra.mxu0 %v923_v30 }
  0x26   : > { %861 = vmatpush3.bf16.msra.mxu1 %v924_v31 }
  0x28   : > { %571 = vmatmul.mubr.bf16.vlgmr.msra.gmra.mrb[0].mxu0 %v783_v34 }
  0x29   : > { %611 = vmatmul.mubr.bf16.vlgmr.msra.gmra.mrb[0].mxu1 %v785_v36 }
  0xfb   : > { %v840_v40 = vpop.f32.mrb[0].mxu0 }
  0xfc   : > { %v862_v41 = vpop.f32.mrb[0].mxu1  ;;  %v841_v42 = vpop.f32.mrb[1].mxu0 }
  0xfd   : > { %v863_v43 = vpop.f32.mrb[1].mxu1  ;;  %v842_v44 = vadd.f32 %v841_v42, %v840_v40  ;;  %v843_v46 = vpop.f32.mrb[2].mxu0 }
  0xfe   : > { %v864_v45 = vadd.f32 %v863_v43, %v862_v41  ;;  %v865_v47 = vpop.f32.mrb[2].mxu1  ;;  %v844_v49 = vpop.f32.mrb[3].mxu0 }
  0xff   : > { %v866_v50 = vpop.f32.mrb[3].mxu1 }
 0x100   : > { %v613_v51 = vadd.f32 %v864_v45, %v842_v44 }
 0x102   : > { %v631_v54 = vadd.f32 %v819_v48, %v613_v51 }
 0x104   : > { %v637_v55 = vmul.f32 %v820_v53, %v631_v54 }
 0x106   : > { %v638_v56 = vrot.slane %v637_v55, 4 }
 0x108   : > { %v639_v57 = vadd.f32 %v638_v56, %v637_v55 }
 0x10a   : > { %v640_v58 = vrot.slane %v639_v57, 2 }
 0x10c   : > { %v641_v59 = vadd.f32 %v640_v58, %v639_v57 }
 0x10e   : > { %v642_v60 = vrot.slane %v641_v59, 1 }
 0x110   : > { %v643_v61 = vadd.f32 %v642_v60, %v641_v59 }
 0x112   : > { %v644_v62 = vmul.f32 0.25, %v643_v61 }
 0x114   : > { %v645_v63 = vsub.f32 %v631_v54, %v644_v62 }
 0x116   : > { %v646_v0 = vmul.f32 %v645_v63, %v645_v63 }
 0x118   : > { %v647_v1 = vmul.f32 %v820_v53, %v646_v0 }
 0x11a   : > { %v648_v2 = vrot.slane %v647_v1, 4 }
 0x11c   : > { %v649_v3 = vadd.f32 %v648_v2, %v647_v1 }
 0x11e   : > { %v650_v4 = vrot.slane %v649_v3, 2 }
 0x120   : > { %v651_v5 = vadd.f32 %v650_v4, %v649_v3 }
 0x122   : > { %v652_v6 = vrot.slane %v651_v5, 1 }
 0x124   : > { %v653_v7 = vadd.f32 %v652_v6, %v651_v5 }
 0x126   : > { %v654_v8 = vmul.f32 0.25, %v653_v7 }
 0x128   : > { %v655_v9 = vadd.f32 1e-05, %v654_v8 }
 0x12a   : > { %929 = vrsqrt.f32 %v655_v9 }
 0x134   : > { %v930_v10 = vpop.eup %929 }
 0x135   : > { %v657_v11 = vmul.f32 %v930_v10, %v645_v63 }
 0x137   : > { %vm658_vm1 = vcmp.ge.f32.partialorder %v657_v11, 0.0  ;;  %v659_v12 = vmul.f32 0.2, %v657_v11 }
 0x139   : > { %v660_v13 = vsel %vm658_vm1, %v657_v11, %v659_v12 }
 0x13a   : > { %661 = vst [vmem:[%s258_s20] sm:$0xff] %v660_v13 }
 0x13b PF: > { %s13_s14 = sadd.s32 1, %s953_s14   ;;  %s1120_s12 = smov %s949_s13 }
 0x13c   : > { %p10_p5 = scmp.ge.s32.totalorder %s13_s14, 4   ;;  %s1121_s13 = smov %s1123_s15 }
 0x13e   :  { %12 = sbr.rel (!%p10_p5) target bundleno = 2 (0x2), region = 76 }

// kernel: discriminator_forward.9
= control target key start
LH: loop header
LB: loop body
LE: loop exit
PB: predicated region body
PF: predicated region fallthrough
CT: control target
= control target key end

     0   :  { %v193_v0 = vmov 0.0   ;;  %vm194_vm0 = vmmov 0   ;;  %s248_s1 = inlined_call_operand.vmem [shape: bf16[128,128], index: 1, kind: input, shape index: {}]   ;;  %s249_s0 = inlined_call_operand.vmem [shape: bf16[8,128], index: 0, kind: input, shape index: {}]   ;;  %s250_s2 = inlined_call_operand.vmem [shape: f32[1,128], index: 2, kind: input, shape index: {}]   ;;  %s251_s3 = inlined_call_operand.vmem [shape: f32[8,128], index: 3, kind: output, shape index: {}]  }
   0x1   :  { %163 = vmatprep.subr.bf16.mxu0 %v193_v0  ;;  %v185_v1 = vld [vmem:[%s248_s1] sm:$0xff]   ;;  %179 = vmatprep.mubr.msk.bf16.mxu0 %vm194_vm0, %v193_v0  ;;  %v186_v2 = vld [vmem:[%s248_s1 + $0x8] sm:$0xff]   ;;  %v187_v3 = vld [vmem:[%s248_s1 + $0x10] sm:$0xff]  }
   0x2   :  { %164 = vmatpush3.bf16.msra.mxu0 %v185_v1  ;;  %v188_v4 = vld [vmem:[%s248_s1 + $0x18] sm:$0xff]   ;;  %v189_v5 = vld [vmem:[%s248_s1 + $0x20] sm:$0xff]   ;;  %v190_v6 = vld [vmem:[%s248_s1 + $0x28] sm:$0xff]  }
   0x3   :  { %165 = vmatprep.subr.bf16.mxu0 %v193_v0  ;;  %v191_v7 = vld [vmem:[%s248_s1 + $0x30] sm:$0xff]   ;;  %v192_v8 = vld [vmem:[%s248_s1 + $0x38] sm:$0xff]   ;;  %v21_v9 = vld [vmem:[%s249_s0] sm:$0xf] }
   0x4   :  { %v153_v10 = vld [vmem:[%s250_s2] ss:$0 sm:$0xff] }
   0x6   :  { %166 = vmatpush3.bf16.msra.mxu0 %v186_v2 }
   0x7   :  { %167 = vmatprep.subr.bf16.mxu0 %v193_v0 }
   0xa   :  { %168 = vmatpush3.bf16.msra.mxu0 %v187_v3 }
   0xb   :  { %169 = vmatprep.subr.bf16.mxu0 %v193_v0 }
   0xe   :  { %170 = vmatpush3.bf16.msra.mxu0 %v188_v4 }
   0xf   :  { %171 = vmatprep.subr.bf16.mxu0 %v193_v0 }
  0x12   :  { %172 = vmatpush3.bf16.msra.mxu0 %v189_v5 }
  0x13   :  { %173 = vmatprep.subr.bf16.mxu0 %v193_v0 }
  0x16   :  { %174 = vmatpush3.bf16.msra.mxu0 %v190_v6 }
  0x17   :  { %175 = vmatprep.subr.bf16.mxu0 %v193_v0 }
  0x1a   :  { %176 = vmatpush3.bf16.msra.mxu0 %v191_v7 }
  0x1b   :  { %177 = vmatprep.subr.bf16.mxu0 %v193_v0 }
  0x1e   :  { %178 = vmatpush3.bf16.msra.mxu0 %v192_v8 }
  0x21   :  { %180 = vmatmul.mubr.bf16.vlgmr.msra.gmra.mrb[0].mxu0 %v21_v9 }
  0xf4   :  { %v120_v11 = vpop.f32.mrb[0].mxu0 }
  0xf5   :  { %v139_v12 = vadd.f32 %v153_v10, %v120_v11  ;;  %v181_v13 = vpop.f32.mrb[1].mxu0 }
  0xf6   :  { %v123_v14 = vpop.f32.mrb[2].mxu0 }
  0xf7   :  { %140 = vst [vmem:[%s251_s3] sm:$0xff] %v139_v12  ;;  %v182_v15 = vpop.f32.mrb[3].mxu0 }

</bundles_post_ra>
